<compile_context>
chip_gen: v7x
topology: tpu7x:2x2x1
jax: 0.10.0
libtpu: 0.0.40
codegen_flags: <defaults>
</compile_context>

<pallas_src>
import jax
import jax.numpy as jnp
from jax import lax
from jax.experimental import pallas as pl
from jax.experimental.pallas import tpu as pltpu

MAX_LAYER = 10          # act_max_layer
THRESHOLD = 0.9         # 1 - act_epsilon, act_epsilon = 0.1
STATS_LANES = 128       # lane-dense packing width for the (B,) statistics


def _act_rnn_kernel(x_ref, h0_ref, wx_ref, wh_ref, be_ref, bl_ref, whalt_ref,
                    bhalt_ref, merged_ref, stats_ref):
    """Whole ACT depth loop stays in VMEM: 1 hoisted + 9 recurrent MXU matmuls."""
    f32 = jnp.float32
    bf16 = jnp.bfloat16

    x = x_ref[...]                       # (Bt, D) f32
    h = h0_ref[...]                      # (Bt, D) f32
    wh = wh_ref[...]                     # (D, D)  bf16
    whalt = whalt_ref[...]               # (1, D)  f32
    bhalt = bhalt_ref[0, 0]              # scalar from SMEM

    Bt, D = x.shape

    # Input projection is depth-invariant -> one MXU matmul, hoisted.
    # Bias (+ depth-flag column for depth<=1) folded in once, outside the loop.
    x_proj = jnp.dot(x.astype(bf16), wx_ref[...], preferred_element_type=f32)
    xb_early = x_proj + be_ref[...]      # depths 0,1 : b + w_depth
    xb_late = x_proj + bl_ref[...]       # depths >=2 : b

    acc = jnp.zeros((Bt, 1), f32)
    merged = jnp.zeros((Bt, D), f32)
    hp_m = jnp.zeros((Bt, 1), f32)
    num = jnp.zeros((Bt, 1), f32)

    def halting_update(h, acc, merged, hp_m, num, force_halt):
        # Halting path: VPU mul + XLU lane reduce + EUP sigmoid -> co-issues
        # with / hides under the recurrent MXU matmul.
        alive = (acc < 1.0).astype(f32)
        p = jax.nn.sigmoid(jnp.sum(h * whalt, axis=-1, keepdims=True) + bhalt)
        if force_halt:                                   # compile-time constant
            new_halted = jnp.ones_like(acc)
        else:
            new_halted = ((p * alive + acc) > THRESHOLD).astype(f32)
        # NOTE: already-halted elements keep adding a ~1e-15 remainder each step;
        # this matches the fixed-depth reference (and PyTorch to ~1e-14).
        remainder = 1.0 - acc + 1e-15
        alive = alive * (1.0 - new_halted)
        step_hp = p * alive + remainder * new_halted
        return (acc + step_hp,                  # halting_prob_acc
                merged + step_hp * h,           # mean-field merge (pre-update h)
                hp_m + step_hp * alive,         # (halting_probs * alive_masks).sum
                num + alive)                    # alive_masks.sum

    def rnn_update(h, xb):
        return jnp.tanh(xb + jnp.dot(h.astype(bf16), wh,
                                     preferred_element_type=f32))

    # depths 0, 1 (depth_flag == 1), fully unrolled.
    for _ in range(2):
        acc, merged, hp_m, num = halting_update(h, acc, merged, hp_m, num, False)
        h = rnn_update(h, xb_early)

    # depths 2 .. MAX_LAYER-2 (depth_flag == 0), unrolled for LLO visibility.
    def mid_body(_, c):
        h, acc, merged, hp_m, num = c
        acc, merged, hp_m, num = halting_update(h, acc, merged, hp_m, num, False)
        return (rnn_update(h, xb_late), acc, merged, hp_m, num)

    h, acc, merged, hp_m, num = lax.fori_loop(
        0, MAX_LAYER - 3, mid_body, (h, acc, merged, hp_m, num), unroll=True)

    # depth MAX_LAYER-1: forced halt; its post-update hidden is never used,
    # so the final recurrent matmul is skipped.
    acc, merged, hp_m, num = halting_update(h, acc, merged, hp_m, num, True)

    merged_ref[...] = merged
    # Lane-dense stats slab: column 0 = halting_prob_acc, column 1 = num_updated.
    lane = lax.broadcasted_iota(jnp.int32, (Bt, STATS_LANES), 1)
    stats_ref[...] = (jnp.where(lane == 0, hp_m, 0.0)
                      + jnp.where(lane == 1, num, 0.0))


@jax.jit
def act_rnn_cell(x, h0, wx, wh, b, wdepth, whalt, bhalt):
    """Returns (merged_hidden, merged_output, halting_prob_acc, num_updated)."""
    B, D = x.shape
    # Batch tile: one program for small B; 256-wide parallel tiles for large B
    # so the two v7x TensorCores split the batch.
    Bt = 256 if B % 256 == 0 else B
    grid = (B // Bt,)

    wx_bf = wx.astype(jnp.bfloat16)
    wh_bf = wh.astype(jnp.bfloat16)
    b_early = (b + wdepth).reshape(1, D).astype(jnp.float32)   # depth flag folded
    b_late = b.reshape(1, D).astype(jnp.float32)
    whalt2 = whalt.reshape(1, D).astype(jnp.float32)
    bhalt2 = jnp.reshape(bhalt, (1, 1)).astype(jnp.float32)

    # Explicit VMEM budget (bf16 weights + f32 activations, double-buffered),
    # capped at v7x's 64 MiB physical VMEM.
    est = 4 * (2 * D * D * 2 + 8 * Bt * D * 4) + (2 << 20)
    vmem_limit = int(min(max(est, 16 << 20), 64 << 20))

    full2d = lambda shape: pl.BlockSpec(shape, lambda i: (0, 0))

    merged, stats = pl.pallas_call(
        _act_rnn_kernel,
        out_shape=(jax.ShapeDtypeStruct((B, D), jnp.float32),
                   jax.ShapeDtypeStruct((B, STATS_LANES), jnp.float32)),
        grid=grid,
        in_specs=[
            pl.BlockSpec((Bt, D), lambda i: (i, 0)),            # x
            pl.BlockSpec((Bt, D), lambda i: (i, 0)),            # h0
            full2d((D, D)),                                     # Wx (bf16)
            full2d((D, D)),                                     # Wh (bf16)
            full2d((1, D)),                                     # b + w_depth
            full2d((1, D)),                                     # b
            full2d((1, D)),                                     # w_halt
            pl.BlockSpec(memory_space=pltpu.MemorySpace.SMEM),  # b_halt scalar
        ],
        out_specs=(pl.BlockSpec((Bt, D), lambda i: (i, 0)),
                   pl.BlockSpec((Bt, STATS_LANES), lambda i: (i, 0))),
        compiler_params=pltpu.CompilerParams(
            dimension_semantics=("parallel",),
            vmem_limit_bytes=vmem_limit),
    )(x, h0, wx_bf, wh_bf, b_early, b_late, whalt2, bhalt2)

    # merged_output == get_output_state(merged_hidden) == merged_hidden
    return merged, merged, stats[:, 0], stats[:, 1]


def _reference(x, h0, wx, wh, b, wdepth, whalt, bhalt):
    """Plain-JAX mirror of the fixed-depth ACT loop (same bf16/f32 numerics)."""
    bf16 = jnp.bfloat16
    B, D = x.shape
    x_proj = jnp.dot(x.astype(bf16), wx.astype(bf16),
                     preferred_element_type=jnp.float32)
    xb_early = x_proj + (b + wdepth)[None, :]
    xb_late = x_proj + b[None, :]
    h = h0
    acc = jnp.zeros((B, 1), jnp.float32)
    merged = jnp.zeros((B, D), jnp.float32)
    hp_m = jnp.zeros((B, 1), jnp.float32)
    num = jnp.zeros((B, 1), jnp.float32)
    for d in range(MAX_LAYER):
        alive = (acc < 1.0).astype(jnp.float32)
        p = jax.nn.sigmoid(jnp.sum(h * whalt[None, :], axis=-1, keepdims=True)
                           + bhalt)
        new_halted = ((p * alive + acc) > THRESHOLD).astype(jnp.float32)
        if d == MAX_LAYER - 1:
            new_halted = jnp.ones_like(new_halted)
        remainder = 1.0 - acc + 1e-15
        alive = alive * (1.0 - new_halted)
        step_hp = p * alive + remainder * new_halted
        acc = acc + step_hp
        merged = merged + step_hp * h
        hp_m = hp_m + step_hp * alive
        num = num + alive
        if d < MAX_LAYER - 1:
            xb = xb_early if d <= 1 else xb_late
            h = jnp.tanh(xb + jnp.dot(h.astype(bf16), wh.astype(bf16),
                                      preferred_element_type=jnp.float32))
    return merged, merged, hp_m[:, 0], num[:, 0]


if __name__ == "__main__":
    key = jax.random.PRNGKey(0)
    B, D = 8, 128    # batch, hidden_dim (lane-aligned)
    ks = jax.random.split(key, 8)

    x = jax.random.normal(ks[0], (B, D), jnp.float32)
    h0 = jax.random.normal(ks[1], (B, D), jnp.float32) * 0.1
    wx = jax.random.normal(ks[2], (D, D), jnp.float32) / jnp.sqrt(D)
    wh = jax.random.normal(ks[3], (D, D), jnp.float32) / jnp.sqrt(D)
    b = jax.random.normal(ks[4], (D,), jnp.float32) * 0.1
    wdepth = jax.random.normal(ks[5], (D,), jnp.float32) * 0.1
    whalt = jax.random.normal(ks[6], (D,), jnp.float32) / jnp.sqrt(D)
    bhalt = jnp.float32(-0.5)   # halting takes a few depth steps

    outs = jax.block_until_ready(
        act_rnn_cell(x, h0, wx, wh, b, wdepth, whalt, bhalt))
    refs = _reference(x, h0, wx, wh, b, wdepth, whalt, bhalt)

    names = ("merged_hidden", "merged_output", "halting_prob_acc", "num_updated")
    for name, a, r in zip(names, outs, refs):
        assert a.shape == r.shape, (name, a.shape, r.shape)
        assert jnp.allclose(a, r, atol=2e-3, rtol=2e-3), (name, a, r)

    print("KERNEL_OK")
</pallas_src>

<mosaic_0001>
module attributes {stable_mosaic.version = 11 : i64} {
  func.func @_act_rnn_kernel(%arg0: i32, %arg1: memref<8x128xf32, #tpu.memory_space<vmem>>, %arg2: memref<8x128xf32, #tpu.memory_space<vmem>>, %arg3: memref<128x128xbf16, #tpu.memory_space<vmem>>, %arg4: memref<128x128xbf16, #tpu.memory_space<vmem>>, %arg5: memref<1x128xf32, #tpu.memory_space<vmem>>, %arg6: memref<1x128xf32, #tpu.memory_space<vmem>>, %arg7: memref<1x128xf32, #tpu.memory_space<vmem>>, %arg8: memref<1x1xf32, #tpu.memory_space<smem>>, %arg9: memref<8x128xf32, #tpu.memory_space<vmem>>, %arg10: memref<8x128xf32, #tpu.memory_space<vmem>>) attributes {dimension_semantics = [#tpu.dimension_semantics<parallel>], iteration_bounds = array<i64: 1>, scalar_prefetch = 0 : i64, scratch_operands = 0 : i64, tpu.core_type = #tpu.core_type<tc>, window_params = [{transform_indices = @transform_0, window_bounds = array<i64: 8, 128>}, {transform_indices = @transform_1, window_bounds = array<i64: 8, 128>}, {pipeline_mode = #tpu.pipeline_mode<synchronous>, transform_indices = @transform_2, window_bounds = array<i64: 128, 128>}, {pipeline_mode = #tpu.pipeline_mode<synchronous>, transform_indices = @transform_3, window_bounds = array<i64: 128, 128>}, {pipeline_mode = #tpu.pipeline_mode<synchronous>, transform_indices = @transform_4, window_bounds = array<i64: 1, 128>}, {pipeline_mode = #tpu.pipeline_mode<synchronous>, transform_indices = @transform_5, window_bounds = array<i64: 1, 128>}, {pipeline_mode = #tpu.pipeline_mode<synchronous>, transform_indices = @transform_6, window_bounds = array<i64: 1, 128>}, {transform_indices = @transform_7, window_bounds = array<i64: 1, 1>}, {transform_indices = @transform_8, window_bounds = array<i64: 8, 128>}, {transform_indices = @transform_9, window_bounds = array<i64: 8, 128>}]} {
    %c0 = arith.constant 0 : index
    %c0_0 = arith.constant 0 : index
    %0 = vector.load %arg1[%c0, %c0_0] : memref<8x128xf32, #tpu.memory_space<vmem>>, vector<8x128xf32>
    %c0_1 = arith.constant 0 : index
    %c0_2 = arith.constant 0 : index
    %1 = vector.load %arg2[%c0_1, %c0_2] : memref<8x128xf32, #tpu.memory_space<vmem>>, vector<8x128xf32>
    %c0_3 = arith.constant 0 : index
    %c0_4 = arith.constant 0 : index
    %2 = vector.load %arg4[%c0_3, %c0_4] : memref<128x128xbf16, #tpu.memory_space<vmem>>, vector<128x128xbf16>
    %c0_5 = arith.constant 0 : index
    %c0_6 = arith.constant 0 : index
    %3 = vector.load %arg7[%c0_5, %c0_6] : memref<1x128xf32, #tpu.memory_space<vmem>>, vector<1x128xf32>
    %c0_7 = arith.constant 0 : index
    %c0_8 = arith.constant 0 : index
    %4 = memref.load %arg8[%c0_7, %c0_8] : memref<1x1xf32, #tpu.memory_space<smem>>
    %5 = arith.truncf %0 : vector<8x128xf32> to vector<8x128xbf16>
    %c0_9 = arith.constant 0 : index
    %c0_10 = arith.constant 0 : index
    %6 = vector.load %arg3[%c0_9, %c0_10] : memref<128x128xbf16, #tpu.memory_space<vmem>>, vector<128x128xbf16>
    %cst = arith.constant dense<0.000000e+00> : vector<8x128xf32>
    %7 = tpu.matmul %5, %6, %cst {dimension_numbers = #tpu.dot_dimension_numbers<[1], [0], [0], [1], [0, 0, 1, 1], [], []>} : vector<8x128xbf16>, vector<128x128xbf16>, vector<8x128xf32> -> vector<8x128xf32>
    %c0_11 = arith.constant 0 : index
    %c0_12 = arith.constant 0 : index
    %8 = vector.load %arg5[%c0_11, %c0_12] : memref<1x128xf32, #tpu.memory_space<vmem>>, vector<1x128xf32>
    %9 = vector.broadcast %8 : vector<1x128xf32> to vector<8x128xf32>
    %10 = arith.addf %7, %9 : vector<8x128xf32>
    %c0_13 = arith.constant 0 : index
    %c0_14 = arith.constant 0 : index
    %11 = vector.load %arg6[%c0_13, %c0_14] : memref<1x128xf32, #tpu.memory_space<vmem>>, vector<1x128xf32>
    %12 = vector.broadcast %11 : vector<1x128xf32> to vector<8x128xf32>
    %13 = arith.addf %7, %12 : vector<8x128xf32>
    %cst_15 = arith.constant 0.000000e+00 : f32
    %14 = vector.broadcast %cst_15 : f32 to vector<8x1xf32>
    %cst_16 = arith.constant 0.000000e+00 : f32
    %15 = vector.broadcast %cst_16 : f32 to vector<8x128xf32>
    %cst_17 = arith.constant 0.000000e+00 : f32
    %16 = vector.broadcast %cst_17 : f32 to vector<8x1xf32>
    %cst_18 = arith.constant 0.000000e+00 : f32
    %17 = vector.broadcast %cst_18 : f32 to vector<8x1xf32>
    %cst_19 = arith.constant 1.000000e+00 : f32
    %18 = vector.broadcast %cst_19 : f32 to vector<8x1xf32>
    %19 = arith.cmpf olt, %14, %18 : vector<8x1xf32>
    %20 = arith.extui %19 : vector<8x1xi1> to vector<8x1xi32>
    %21 = arith.sitofp %20 : vector<8x1xi32> to vector<8x1xf32>
    %22 = vector.broadcast %3 : vector<1x128xf32> to vector<8x128xf32>
    %23 = arith.mulf %1, %22 : vector<8x128xf32>
    %cst_20 = arith.constant dense<0.000000e+00> : vector<8xf32>
    %24 = vector.multi_reduction <add>, %23, %cst_20 [1] : vector<8x128xf32> to vector<8xf32>
    %25 = vector.shape_cast %24 : vector<8xf32> to vector<8x1xf32>
    %26 = vector.broadcast %4 : f32 to vector<8x1xf32>
    %27 = arith.addf %25, %26 : vector<8x1xf32>
    %28 = arith.negf %27 : vector<8x1xf32>
    %29 = math.exp %28 : vector<8x1xf32>
    %cst_21 = arith.constant 1.000000e+00 : f32
    %30 = vector.broadcast %cst_21 : f32 to vector<8x1xf32>
    %31 = arith.addf %30, %29 : vector<8x1xf32>
    %32 = arith.divf %30, %31 : vector<8x1xf32>
    %33 = arith.mulf %32, %21 : vector<8x1xf32>
    %34 = arith.addf %33, %14 : vector<8x1xf32>
    %cst_22 = arith.constant 0.899999976 : f32
    %35 = vector.broadcast %cst_22 : f32 to vector<8x1xf32>
    %36 = arith.cmpf ogt, %34, %35 : vector<8x1xf32>
    %37 = arith.extui %36 : vector<8x1xi1> to vector<8x1xi32>
    %38 = arith.sitofp %37 : vector<8x1xi32> to vector<8x1xf32>
    %cst_23 = arith.constant 1.000000e+00 : f32
    %39 = vector.broadcast %cst_23 : f32 to vector<8x1xf32>
    %40 = arith.subf %39, %14 : vector<8x1xf32>
    %cst_24 = arith.constant 1.000000e-15 : f32
    %41 = vector.broadcast %cst_24 : f32 to vector<8x1xf32>
    %42 = arith.addf %40, %41 : vector<8x1xf32>
    %cst_25 = arith.constant 1.000000e+00 : f32
    %43 = vector.broadcast %cst_25 : f32 to vector<8x1xf32>
    %44 = arith.subf %43, %38 : vector<8x1xf32>
    %45 = arith.mulf %21, %44 : vector<8x1xf32>
    %46 = arith.mulf %32, %45 : vector<8x1xf32>
    %47 = arith.mulf %42, %38 : vector<8x1xf32>
    %48 = arith.addf %46, %47 : vector<8x1xf32>
    %49 = arith.addf %14, %48 : vector<8x1xf32>
    %50 = vector.broadcast %48 : vector<8x1xf32> to vector<8x128xf32>
    %51 = arith.mulf %50, %1 : vector<8x128xf32>
    %52 = arith.addf %15, %51 : vector<8x128xf32>
    %53 = arith.mulf %48, %45 : vector<8x1xf32>
    %54 = arith.addf %16, %53 : vector<8x1xf32>
    %55 = arith.addf %17, %45 : vector<8x1xf32>
    %56 = arith.truncf %1 : vector<8x128xf32> to vector<8x128xbf16>
    %cst_26 = arith.constant dense<0.000000e+00> : vector<8x128xf32>
    %57 = tpu.matmul %56, %2, %cst_26 {dimension_numbers = #tpu.dot_dimension_numbers<[1], [0], [0], [1], [0, 0, 1, 1], [], []>} : vector<8x128xbf16>, vector<128x128xbf16>, vector<8x128xf32> -> vector<8x128xf32>
    %58 = arith.addf %10, %57 : vector<8x128xf32>
    %59 = math.tanh %58 : vector<8x128xf32>
    %cst_27 = arith.constant 1.000000e+00 : f32
    %60 = vector.broadcast %cst_27 : f32 to vector<8x1xf32>
    %61 = arith.cmpf olt, %49, %60 : vector<8x1xf32>
    %62 = arith.extui %61 : vector<8x1xi1> to vector<8x1xi32>
    %63 = arith.sitofp %62 : vector<8x1xi32> to vector<8x1xf32>
    %64 = vector.broadcast %3 : vector<1x128xf32> to vector<8x128xf32>
    %65 = arith.mulf %59, %64 : vector<8x128xf32>
    %cst_28 = arith.constant dense<0.000000e+00> : vector<8xf32>
    %66 = vector.multi_reduction <add>, %65, %cst_28 [1] : vector<8x128xf32> to vector<8xf32>
    %67 = vector.shape_cast %66 : vector<8xf32> to vector<8x1xf32>
    %68 = vector.broadcast %4 : f32 to vector<8x1xf32>
    %69 = arith.addf %67, %68 : vector<8x1xf32>
    %70 = arith.negf %69 : vector<8x1xf32>
    %71 = math.exp %70 : vector<8x1xf32>
    %cst_29 = arith.constant 1.000000e+00 : f32
    %72 = vector.broadcast %cst_29 : f32 to vector<8x1xf32>
    %73 = arith.addf %72, %71 : vector<8x1xf32>
    %74 = arith.divf %72, %73 : vector<8x1xf32>
    %75 = arith.mulf %74, %63 : vector<8x1xf32>
    %76 = arith.addf %75, %49 : vector<8x1xf32>
    %cst_30 = arith.constant 0.899999976 : f32
    %77 = vector.broadcast %cst_30 : f32 to vector<8x1xf32>
    %78 = arith.cmpf ogt, %76, %77 : vector<8x1xf32>
    %79 = arith.extui %78 : vector<8x1xi1> to vector<8x1xi32>
    %80 = arith.sitofp %79 : vector<8x1xi32> to vector<8x1xf32>
    %cst_31 = arith.constant 1.000000e+00 : f32
    %81 = vector.broadcast %cst_31 : f32 to vector<8x1xf32>
    %82 = arith.subf %81, %49 : vector<8x1xf32>
    %cst_32 = arith.constant 1.000000e-15 : f32
    %83 = vector.broadcast %cst_32 : f32 to vector<8x1xf32>
    %84 = arith.addf %82, %83 : vector<8x1xf32>
    %cst_33 = arith.constant 1.000000e+00 : f32
    %85 = vector.broadcast %cst_33 : f32 to vector<8x1xf32>
    %86 = arith.subf %85, %80 : vector<8x1xf32>
    %87 = arith.mulf %63, %86 : vector<8x1xf32>
    %88 = arith.mulf %74, %87 : vector<8x1xf32>
    %89 = arith.mulf %84, %80 : vector<8x1xf32>
    %90 = arith.addf %88, %89 : vector<8x1xf32>
    %91 = arith.addf %49, %90 : vector<8x1xf32>
    %92 = vector.broadcast %90 : vector<8x1xf32> to vector<8x128xf32>
    %93 = arith.mulf %92, %59 : vector<8x128xf32>
    %94 = arith.addf %52, %93 : vector<8x128xf32>
    %95 = arith.mulf %90, %87 : vector<8x1xf32>
    %96 = arith.addf %54, %95 : vector<8x1xf32>
    %97 = arith.addf %55, %87 : vector<8x1xf32>
    %98 = arith.truncf %59 : vector<8x128xf32> to vector<8x128xbf16>
    %cst_34 = arith.constant dense<0.000000e+00> : vector<8x128xf32>
    %99 = tpu.matmul %98, %2, %cst_34 {dimension_numbers = #tpu.dot_dimension_numbers<[1], [0], [0], [1], [0, 0, 1, 1], [], []>} : vector<8x128xbf16>, vector<128x128xbf16>, vector<8x128xf32> -> vector<8x128xf32>
    %100 = arith.addf %10, %99 : vector<8x128xf32>
    %101 = math.tanh %100 : vector<8x128xf32>
    %c0_i32 = arith.constant 0 : i32
    %cst_35 = arith.constant 1.000000e+00 : f32
    %102 = vector.broadcast %cst_35 : f32 to vector<8x1xf32>
    %103 = arith.cmpf olt, %91, %102 : vector<8x1xf32>
    %104 = arith.extui %103 : vector<8x1xi1> to vector<8x1xi32>
    %105 = arith.sitofp %104 : vector<8x1xi32> to vector<8x1xf32>
    %106 = vector.broadcast %3 : vector<1x128xf32> to vector<8x128xf32>
    %107 = arith.mulf %101, %106 : vector<8x128xf32>
    %cst_36 = arith.constant dense<0.000000e+00> : vector<8xf32>
    %108 = vector.multi_reduction <add>, %107, %cst_36 [1] : vector<8x128xf32> to vector<8xf32>
    %109 = vector.shape_cast %108 : vector<8xf32> to vector<8x1xf32>
    %110 = vector.broadcast %4 : f32 to vector<8x1xf32>
    %111 = arith.addf %109, %110 : vector<8x1xf32>
    %112 = arith.negf %111 : vector<8x1xf32>
    %113 = math.exp %112 : vector<8x1xf32>
    %cst_37 = arith.constant 1.000000e+00 : f32
    %114 = vector.broadcast %cst_37 : f32 to vector<8x1xf32>
    %115 = arith.addf %114, %113 : vector<8x1xf32>
    %116 = arith.divf %114, %115 : vector<8x1xf32>
    %117 = arith.mulf %116, %105 : vector<8x1xf32>
    %118 = arith.addf %117, %91 : vector<8x1xf32>
    %cst_38 = arith.constant 0.899999976 : f32
    %119 = vector.broadcast %cst_38 : f32 to vector<8x1xf32>
    %120 = arith.cmpf ogt, %118, %119 : vector<8x1xf32>
    %121 = arith.extui %120 : vector<8x1xi1> to vector<8x1xi32>
    %122 = arith.sitofp %121 : vector<8x1xi32> to vector<8x1xf32>
    %cst_39 = arith.constant 1.000000e+00 : f32
    %123 = vector.broadcast %cst_39 : f32 to vector<8x1xf32>
    %124 = arith.subf %123, %91 : vector<8x1xf32>
    %cst_40 = arith.constant 1.000000e-15 : f32
    %125 = vector.broadcast %cst_40 : f32 to vector<8x1xf32>
    %126 = arith.addf %124, %125 : vector<8x1xf32>
    %cst_41 = arith.constant 1.000000e+00 : f32
    %127 = vector.broadcast %cst_41 : f32 to vector<8x1xf32>
    %128 = arith.subf %127, %122 : vector<8x1xf32>
    %129 = arith.mulf %105, %128 : vector<8x1xf32>
    %130 = arith.mulf %116, %129 : vector<8x1xf32>
    %131 = arith.mulf %126, %122 : vector<8x1xf32>
    %132 = arith.addf %130, %131 : vector<8x1xf32>
    %133 = arith.addf %91, %132 : vector<8x1xf32>
    %134 = vector.broadcast %132 : vector<8x1xf32> to vector<8x128xf32>
    %135 = arith.mulf %134, %101 : vector<8x128xf32>
    %136 = arith.addf %94, %135 : vector<8x128xf32>
    %137 = arith.mulf %132, %129 : vector<8x1xf32>
    %138 = arith.addf %96, %137 : vector<8x1xf32>
    %139 = arith.addf %97, %129 : vector<8x1xf32>
    %140 = arith.truncf %101 : vector<8x128xf32> to vector<8x128xbf16>
    %cst_42 = arith.constant dense<0.000000e+00> : vector<8x128xf32>
    %141 = tpu.matmul %140, %2, %cst_42 {dimension_numbers = #tpu.dot_dimension_numbers<[1], [0], [0], [1], [0, 0, 1, 1], [], []>} : vector<8x128xbf16>, vector<128x128xbf16>, vector<8x128xf32> -> vector<8x128xf32>
    %142 = arith.addf %13, %141 : vector<8x128xf32>
    %143 = math.tanh %142 : vector<8x128xf32>
    %c1_i32 = arith.constant 1 : i32
    %cst_43 = arith.constant 1.000000e+00 : f32
    %144 = vector.broadcast %cst_43 : f32 to vector<8x1xf32>
    %145 = arith.cmpf olt, %133, %144 : vector<8x1xf32>
    %146 = arith.extui %145 : vector<8x1xi1> to vector<8x1xi32>
    %147 = arith.sitofp %146 : vector<8x1xi32> to vector<8x1xf32>
    %148 = vector.broadcast %3 : vector<1x128xf32> to vector<8x128xf32>
    %149 = arith.mulf %143, %148 : vector<8x128xf32>
    %cst_44 = arith.constant dense<0.000000e+00> : vector<8xf32>
    %150 = vector.multi_reduction <add>, %149, %cst_44 [1] : vector<8x128xf32> to vector<8xf32>
    %151 = vector.shape_cast %150 : vector<8xf32> to vector<8x1xf32>
    %152 = vector.broadcast %4 : f32 to vector<8x1xf32>
    %153 = arith.addf %151, %152 : vector<8x1xf32>
    %154 = arith.negf %153 : vector<8x1xf32>
    %155 = math.exp %154 : vector<8x1xf32>
    %cst_45 = arith.constant 1.000000e+00 : f32
    %156 = vector.broadcast %cst_45 : f32 to vector<8x1xf32>
    %157 = arith.addf %156, %155 : vector<8x1xf32>
    %158 = arith.divf %156, %157 : vector<8x1xf32>
    %159 = arith.mulf %158, %147 : vector<8x1xf32>
    %160 = arith.addf %159, %133 : vector<8x1xf32>
    %cst_46 = arith.constant 0.899999976 : f32
    %161 = vector.broadcast %cst_46 : f32 to vector<8x1xf32>
    %162 = arith.cmpf ogt, %160, %161 : vector<8x1xf32>
    %163 = arith.extui %162 : vector<8x1xi1> to vector<8x1xi32>
    %164 = arith.sitofp %163 : vector<8x1xi32> to vector<8x1xf32>
    %cst_47 = arith.constant 1.000000e+00 : f32
    %165 = vector.broadcast %cst_47 : f32 to vector<8x1xf32>
    %166 = arith.subf %165, %133 : vector<8x1xf32>
    %cst_48 = arith.constant 1.000000e-15 : f32
    %167 = vector.broadcast %cst_48 : f32 to vector<8x1xf32>
    %168 = arith.addf %166, %167 : vector<8x1xf32>
    %cst_49 = arith.constant 1.000000e+00 : f32
    %169 = vector.broadcast %cst_49 : f32 to vector<8x1xf32>
    %170 = arith.subf %169, %164 : vector<8x1xf32>
    %171 = arith.mulf %147, %170 : vector<8x1xf32>
    %172 = arith.mulf %158, %171 : vector<8x1xf32>
    %173 = arith.mulf %168, %164 : vector<8x1xf32>
    %174 = arith.addf %172, %173 : vector<8x1xf32>
    %175 = arith.addf %133, %174 : vector<8x1xf32>
    %176 = vector.broadcast %174 : vector<8x1xf32> to vector<8x128xf32>
    %177 = arith.mulf %176, %143 : vector<8x128xf32>
    %178 = arith.addf %136, %177 : vector<8x128xf32>
    %179 = arith.mulf %174, %171 : vector<8x1xf32>
    %180 = arith.addf %138, %179 : vector<8x1xf32>
    %181 = arith.addf %139, %171 : vector<8x1xf32>
    %182 = arith.truncf %143 : vector<8x128xf32> to vector<8x128xbf16>
    %cst_50 = arith.constant dense<0.000000e+00> : vector<8x128xf32>
    %183 = tpu.matmul %182, %2, %cst_50 {dimension_numbers = #tpu.dot_dimension_numbers<[1], [0], [0], [1], [0, 0, 1, 1], [], []>} : vector<8x128xbf16>, vector<128x128xbf16>, vector<8x128xf32> -> vector<8x128xf32>
    %184 = arith.addf %13, %183 : vector<8x128xf32>
    %185 = math.tanh %184 : vector<8x128xf32>
    %c2_i32 = arith.constant 2 : i32
    %cst_51 = arith.constant 1.000000e+00 : f32
    %186 = vector.broadcast %cst_51 : f32 to vector<8x1xf32>
    %187 = arith.cmpf olt, %175, %186 : vector<8x1xf32>
    %188 = arith.extui %187 : vector<8x1xi1> to vector<8x1xi32>
    %189 = arith.sitofp %188 : vector<8x1xi32> to vector<8x1xf32>
    %190 = vector.broadcast %3 : vector<1x128xf32> to vector<8x128xf32>
    %191 = arith.mulf %185, %190 : vector<8x128xf32>
    %cst_52 = arith.constant dense<0.000000e+00> : vector<8xf32>
    %192 = vector.multi_reduction <add>, %191, %cst_52 [1] : vector<8x128xf32> to vector<8xf32>
    %193 = vector.shape_cast %192 : vector<8xf32> to vector<8x1xf32>
    %194 = vector.broadcast %4 : f32 to vector<8x1xf32>
    %195 = arith.addf %193, %194 : vector<8x1xf32>
    %196 = arith.negf %195 : vector<8x1xf32>
    %197 = math.exp %196 : vector<8x1xf32>
    %cst_53 = arith.constant 1.000000e+00 : f32
    %198 = vector.broadcast %cst_53 : f32 to vector<8x1xf32>
    %199 = arith.addf %198, %197 : vector<8x1xf32>
    %200 = arith.divf %198, %199 : vector<8x1xf32>
    %201 = arith.mulf %200, %189 : vector<8x1xf32>
    %202 = arith.addf %201, %175 : vector<8x1xf32>
    %cst_54 = arith.constant 0.899999976 : f32
    %203 = vector.broadcast %cst_54 : f32 to vector<8x1xf32>
    %204 = arith.cmpf ogt, %202, %203 : vector<8x1xf32>
    %205 = arith.extui %204 : vector<8x1xi1> to vector<8x1xi32>
    %206 = arith.sitofp %205 : vector<8x1xi32> to vector<8x1xf32>
    %cst_55 = arith.constant 1.000000e+00 : f32
    %207 = vector.broadcast %cst_55 : f32 to vector<8x1xf32>
    %208 = arith.subf %207, %175 : vector<8x1xf32>
    %cst_56 = arith.constant 1.000000e-15 : f32
    %209 = vector.broadcast %cst_56 : f32 to vector<8x1xf32>
    %210 = arith.addf %208, %209 : vector<8x1xf32>
    %cst_57 = arith.constant 1.000000e+00 : f32
    %211 = vector.broadcast %cst_57 : f32 to vector<8x1xf32>
    %212 = arith.subf %211, %206 : vector<8x1xf32>
    %213 = arith.mulf %189, %212 : vector<8x1xf32>
    %214 = arith.mulf %200, %213 : vector<8x1xf32>
    %215 = arith.mulf %210, %206 : vector<8x1xf32>
    %216 = arith.addf %214, %215 : vector<8x1xf32>
    %217 = arith.addf %175, %216 : vector<8x1xf32>
    %218 = vector.broadcast %216 : vector<8x1xf32> to vector<8x128xf32>
    %219 = arith.mulf %218, %185 : vector<8x128xf32>
    %220 = arith.addf %178, %219 : vector<8x128xf32>
    %221 = arith.mulf %216, %213 : vector<8x1xf32>
    %222 = arith.addf %180, %221 : vector<8x1xf32>
    %223 = arith.addf %181, %213 : vector<8x1xf32>
    %224 = arith.truncf %185 : vector<8x128xf32> to vector<8x128xbf16>
    %cst_58 = arith.constant dense<0.000000e+00> : vector<8x128xf32>
    %225 = tpu.matmul %224, %2, %cst_58 {dimension_numbers = #tpu.dot_dimension_numbers<[1], [0], [0], [1], [0, 0, 1, 1], [], []>} : vector<8x128xbf16>, vector<128x128xbf16>, vector<8x128xf32> -> vector<8x128xf32>
    %226 = arith.addf %13, %225 : vector<8x128xf32>
    %227 = math.tanh %226 : vector<8x128xf32>
    %c3_i32 = arith.constant 3 : i32
    %cst_59 = arith.constant 1.000000e+00 : f32
    %228 = vector.broadcast %cst_59 : f32 to vector<8x1xf32>
    %229 = arith.cmpf olt, %217, %228 : vector<8x1xf32>
    %230 = arith.extui %229 : vector<8x1xi1> to vector<8x1xi32>
    %231 = arith.sitofp %230 : vector<8x1xi32> to vector<8x1xf32>
    %232 = vector.broadcast %3 : vector<1x128xf32> to vector<8x128xf32>
    %233 = arith.mulf %227, %232 : vector<8x128xf32>
    %cst_60 = arith.constant dense<0.000000e+00> : vector<8xf32>
    %234 = vector.multi_reduction <add>, %233, %cst_60 [1] : vector<8x128xf32> to vector<8xf32>
    %235 = vector.shape_cast %234 : vector<8xf32> to vector<8x1xf32>
    %236 = vector.broadcast %4 : f32 to vector<8x1xf32>
    %237 = arith.addf %235, %236 : vector<8x1xf32>
    %238 = arith.negf %237 : vector<8x1xf32>
    %239 = math.exp %238 : vector<8x1xf32>
    %cst_61 = arith.constant 1.000000e+00 : f32
    %240 = vector.broadcast %cst_61 : f32 to vector<8x1xf32>
    %241 = arith.addf %240, %239 : vector<8x1xf32>
    %242 = arith.divf %240, %241 : vector<8x1xf32>
    %243 = arith.mulf %242, %231 : vector<8x1xf32>
    %244 = arith.addf %243, %217 : vector<8x1xf32>
    %cst_62 = arith.constant 0.899999976 : f32
    %245 = vector.broadcast %cst_62 : f32 to vector<8x1xf32>
    %246 = arith.cmpf ogt, %244, %245 : vector<8x1xf32>
    %247 = arith.extui %246 : vector<8x1xi1> to vector<8x1xi32>
    %248 = arith.sitofp %247 : vector<8x1xi32> to vector<8x1xf32>
    %cst_63 = arith.constant 1.000000e+00 : f32
    %249 = vector.broadcast %cst_63 : f32 to vector<8x1xf32>
    %250 = arith.subf %249, %217 : vector<8x1xf32>
    %cst_64 = arith.constant 1.000000e-15 : f32
    %251 = vector.broadcast %cst_64 : f32 to vector<8x1xf32>
    %252 = arith.addf %250, %251 : vector<8x1xf32>
    %cst_65 = arith.constant 1.000000e+00 : f32
    %253 = vector.broadcast %cst_65 : f32 to vector<8x1xf32>
    %254 = arith.subf %253, %248 : vector<8x1xf32>
    %255 = arith.mulf %231, %254 : vector<8x1xf32>
    %256 = arith.mulf %242, %255 : vector<8x1xf32>
    %257 = arith.mulf %252, %248 : vector<8x1xf32>
    %258 = arith.addf %256, %257 : vector<8x1xf32>
    %259 = arith.addf %217, %258 : vector<8x1xf32>
    %260 = vector.broadcast %258 : vector<8x1xf32> to vector<8x128xf32>
    %261 = arith.mulf %260, %227 : vector<8x128xf32>
    %262 = arith.addf %220, %261 : vector<8x128xf32>
    %263 = arith.mulf %258, %255 : vector<8x1xf32>
    %264 = arith.addf %222, %263 : vector<8x1xf32>
    %265 = arith.addf %223, %255 : vector<8x1xf32>
    %266 = arith.truncf %227 : vector<8x128xf32> to vector<8x128xbf16>
    %cst_66 = arith.constant dense<0.000000e+00> : vector<8x128xf32>
    %267 = tpu.matmul %266, %2, %cst_66 {dimension_numbers = #tpu.dot_dimension_numbers<[1], [0], [0], [1], [0, 0, 1, 1], [], []>} : vector<8x128xbf16>, vector<128x128xbf16>, vector<8x128xf32> -> vector<8x128xf32>
    %268 = arith.addf %13, %267 : vector<8x128xf32>
    %269 = math.tanh %268 : vector<8x128xf32>
    %c4_i32 = arith.constant 4 : i32
    %cst_67 = arith.constant 1.000000e+00 : f32
    %270 = vector.broadcast %cst_67 : f32 to vector<8x1xf32>
    %271 = arith.cmpf olt, %259, %270 : vector<8x1xf32>
    %272 = arith.extui %271 : vector<8x1xi1> to vector<8x1xi32>
    %273 = arith.sitofp %272 : vector<8x1xi32> to vector<8x1xf32>
    %274 = vector.broadcast %3 : vector<1x128xf32> to vector<8x128xf32>
    %275 = arith.mulf %269, %274 : vector<8x128xf32>
    %cst_68 = arith.constant dense<0.000000e+00> : vector<8xf32>
    %276 = vector.multi_reduction <add>, %275, %cst_68 [1] : vector<8x128xf32> to vector<8xf32>
    %277 = vector.shape_cast %276 : vector<8xf32> to vector<8x1xf32>
    %278 = vector.broadcast %4 : f32 to vector<8x1xf32>
    %279 = arith.addf %277, %278 : vector<8x1xf32>
    %280 = arith.negf %279 : vector<8x1xf32>
    %281 = math.exp %280 : vector<8x1xf32>
    %cst_69 = arith.constant 1.000000e+00 : f32
    %282 = vector.broadcast %cst_69 : f32 to vector<8x1xf32>
    %283 = arith.addf %282, %281 : vector<8x1xf32>
    %284 = arith.divf %282, %283 : vector<8x1xf32>
    %285 = arith.mulf %284, %273 : vector<8x1xf32>
    %286 = arith.addf %285, %259 : vector<8x1xf32>
    %cst_70 = arith.constant 0.899999976 : f32
    %287 = vector.broadcast %cst_70 : f32 to vector<8x1xf32>
    %288 = arith.cmpf ogt, %286, %287 : vector<8x1xf32>
    %289 = arith.extui %288 : vector<8x1xi1> to vector<8x1xi32>
    %290 = arith.sitofp %289 : vector<8x1xi32> to vector<8x1xf32>
    %cst_71 = arith.constant 1.000000e+00 : f32
    %291 = vector.broadcast %cst_71 : f32 to vector<8x1xf32>
    %292 = arith.subf %291, %259 : vector<8x1xf32>
    %cst_72 = arith.constant 1.000000e-15 : f32
    %293 = vector.broadcast %cst_72 : f32 to vector<8x1xf32>
    %294 = arith.addf %292, %293 : vector<8x1xf32>
    %cst_73 = arith.constant 1.000000e+00 : f32
    %295 = vector.broadcast %cst_73 : f32 to vector<8x1xf32>
    %296 = arith.subf %295, %290 : vector<8x1xf32>
    %297 = arith.mulf %273, %296 : vector<8x1xf32>
    %298 = arith.mulf %284, %297 : vector<8x1xf32>
    %299 = arith.mulf %294, %290 : vector<8x1xf32>
    %300 = arith.addf %298, %299 : vector<8x1xf32>
    %301 = arith.addf %259, %300 : vector<8x1xf32>
    %302 = vector.broadcast %300 : vector<8x1xf32> to vector<8x128xf32>
    %303 = arith.mulf %302, %269 : vector<8x128xf32>
    %304 = arith.addf %262, %303 : vector<8x128xf32>
    %305 = arith.mulf %300, %297 : vector<8x1xf32>
    %306 = arith.addf %264, %305 : vector<8x1xf32>
    %307 = arith.addf %265, %297 : vector<8x1xf32>
    %308 = arith.truncf %269 : vector<8x128xf32> to vector<8x128xbf16>
    %cst_74 = arith.constant dense<0.000000e+00> : vector<8x128xf32>
    %309 = tpu.matmul %308, %2, %cst_74 {dimension_numbers = #tpu.dot_dimension_numbers<[1], [0], [0], [1], [0, 0, 1, 1], [], []>} : vector<8x128xbf16>, vector<128x128xbf16>, vector<8x128xf32> -> vector<8x128xf32>
    %310 = arith.addf %13, %309 : vector<8x128xf32>
    %311 = math.tanh %310 : vector<8x128xf32>
    %c5_i32 = arith.constant 5 : i32
    %cst_75 = arith.constant 1.000000e+00 : f32
    %312 = vector.broadcast %cst_75 : f32 to vector<8x1xf32>
    %313 = arith.cmpf olt, %301, %312 : vector<8x1xf32>
    %314 = arith.extui %313 : vector<8x1xi1> to vector<8x1xi32>
    %315 = arith.sitofp %314 : vector<8x1xi32> to vector<8x1xf32>
    %316 = vector.broadcast %3 : vector<1x128xf32> to vector<8x128xf32>
    %317 = arith.mulf %311, %316 : vector<8x128xf32>
    %cst_76 = arith.constant dense<0.000000e+00> : vector<8xf32>
    %318 = vector.multi_reduction <add>, %317, %cst_76 [1] : vector<8x128xf32> to vector<8xf32>
    %319 = vector.shape_cast %318 : vector<8xf32> to vector<8x1xf32>
    %320 = vector.broadcast %4 : f32 to vector<8x1xf32>
    %321 = arith.addf %319, %320 : vector<8x1xf32>
    %322 = arith.negf %321 : vector<8x1xf32>
    %323 = math.exp %322 : vector<8x1xf32>
    %cst_77 = arith.constant 1.000000e+00 : f32
    %324 = vector.broadcast %cst_77 : f32 to vector<8x1xf32>
    %325 = arith.addf %324, %323 : vector<8x1xf32>
    %326 = arith.divf %324, %325 : vector<8x1xf32>
    %327 = arith.mulf %326, %315 : vector<8x1xf32>
    %328 = arith.addf %327, %301 : vector<8x1xf32>
    %cst_78 = arith.constant 0.899999976 : f32
    %329 = vector.broadcast %cst_78 : f32 to vector<8x1xf32>
    %330 = arith.cmpf ogt, %328, %329 : vector<8x1xf32>
    %331 = arith.extui %330 : vector<8x1xi1> to vector<8x1xi32>
    %332 = arith.sitofp %331 : vector<8x1xi32> to vector<8x1xf32>
    %cst_79 = arith.constant 1.000000e+00 : f32
    %333 = vector.broadcast %cst_79 : f32 to vector<8x1xf32>
    %334 = arith.subf %333, %301 : vector<8x1xf32>
    %cst_80 = arith.constant 1.000000e-15 : f32
    %335 = vector.broadcast %cst_80 : f32 to vector<8x1xf32>
    %336 = arith.addf %334, %335 : vector<8x1xf32>
    %cst_81 = arith.constant 1.000000e+00 : f32
    %337 = vector.broadcast %cst_81 : f32 to vector<8x1xf32>
    %338 = arith.subf %337, %332 : vector<8x1xf32>
    %339 = arith.mulf %315, %338 : vector<8x1xf32>
    %340 = arith.mulf %326, %339 : vector<8x1xf32>
    %341 = arith.mulf %336, %332 : vector<8x1xf32>
    %342 = arith.addf %340, %341 : vector<8x1xf32>
    %343 = arith.addf %301, %342 : vector<8x1xf32>
    %344 = vector.broadcast %342 : vector<8x1xf32> to vector<8x128xf32>
    %345 = arith.mulf %344, %311 : vector<8x128xf32>
    %346 = arith.addf %304, %345 : vector<8x128xf32>
    %347 = arith.mulf %342, %339 : vector<8x1xf32>
    %348 = arith.addf %306, %347 : vector<8x1xf32>
    %349 = arith.addf %307, %339 : vector<8x1xf32>
    %350 = arith.truncf %311 : vector<8x128xf32> to vector<8x128xbf16>
    %cst_82 = arith.constant dense<0.000000e+00> : vector<8x128xf32>
    %351 = tpu.matmul %350, %2, %cst_82 {dimension_numbers = #tpu.dot_dimension_numbers<[1], [0], [0], [1], [0, 0, 1, 1], [], []>} : vector<8x128xbf16>, vector<128x128xbf16>, vector<8x128xf32> -> vector<8x128xf32>
    %352 = arith.addf %13, %351 : vector<8x128xf32>
    %353 = math.tanh %352 : vector<8x128xf32>
    %c6_i32 = arith.constant 6 : i32
    %cst_83 = arith.constant 1.000000e+00 : f32
    %354 = vector.broadcast %cst_83 : f32 to vector<8x1xf32>
    %355 = arith.cmpf olt, %343, %354 : vector<8x1xf32>
    %356 = arith.extui %355 : vector<8x1xi1> to vector<8x1xi32>
    %357 = arith.sitofp %356 : vector<8x1xi32> to vector<8x1xf32>
    %358 = vector.broadcast %3 : vector<1x128xf32> to vector<8x128xf32>
    %359 = arith.mulf %353, %358 : vector<8x128xf32>
    %cst_84 = arith.constant dense<0.000000e+00> : vector<8xf32>
    %360 = vector.multi_reduction <add>, %359, %cst_84 [1] : vector<8x128xf32> to vector<8xf32>
    %361 = vector.shape_cast %360 : vector<8xf32> to vector<8x1xf32>
    %362 = vector.broadcast %4 : f32 to vector<8x1xf32>
    %363 = arith.addf %361, %362 : vector<8x1xf32>
    %364 = arith.negf %363 : vector<8x1xf32>
    %365 = math.exp %364 : vector<8x1xf32>
    %cst_85 = arith.constant 1.000000e+00 : f32
    %366 = vector.broadcast %cst_85 : f32 to vector<8x1xf32>
    %367 = arith.addf %366, %365 : vector<8x1xf32>
    %368 = arith.divf %366, %367 : vector<8x1xf32>
    %369 = arith.mulf %368, %357 : vector<8x1xf32>
    %370 = arith.addf %369, %343 : vector<8x1xf32>
    %cst_86 = arith.constant 0.899999976 : f32
    %371 = vector.broadcast %cst_86 : f32 to vector<8x1xf32>
    %372 = arith.cmpf ogt, %370, %371 : vector<8x1xf32>
    %373 = arith.extui %372 : vector<8x1xi1> to vector<8x1xi32>
    %374 = arith.sitofp %373 : vector<8x1xi32> to vector<8x1xf32>
    %cst_87 = arith.constant 1.000000e+00 : f32
    %375 = vector.broadcast %cst_87 : f32 to vector<8x1xf32>
    %376 = arith.subf %375, %343 : vector<8x1xf32>
    %cst_88 = arith.constant 1.000000e-15 : f32
    %377 = vector.broadcast %cst_88 : f32 to vector<8x1xf32>
    %378 = arith.addf %376, %377 : vector<8x1xf32>
    %cst_89 = arith.constant 1.000000e+00 : f32
    %379 = vector.broadcast %cst_89 : f32 to vector<8x1xf32>
    %380 = arith.subf %379, %374 : vector<8x1xf32>
    %381 = arith.mulf %357, %380 : vector<8x1xf32>
    %382 = arith.mulf %368, %381 : vector<8x1xf32>
    %383 = arith.mulf %378, %374 : vector<8x1xf32>
    %384 = arith.addf %382, %383 : vector<8x1xf32>
    %385 = arith.addf %343, %384 : vector<8x1xf32>
    %386 = vector.broadcast %384 : vector<8x1xf32> to vector<8x128xf32>
    %387 = arith.mulf %386, %353 : vector<8x128xf32>
    %388 = arith.addf %346, %387 : vector<8x128xf32>
    %389 = arith.mulf %384, %381 : vector<8x1xf32>
    %390 = arith.addf %348, %389 : vector<8x1xf32>
    %391 = arith.addf %349, %381 : vector<8x1xf32>
    %392 = arith.truncf %353 : vector<8x128xf32> to vector<8x128xbf16>
    %cst_90 = arith.constant dense<0.000000e+00> : vector<8x128xf32>
    %393 = tpu.matmul %392, %2, %cst_90 {dimension_numbers = #tpu.dot_dimension_numbers<[1], [0], [0], [1], [0, 0, 1, 1], [], []>} : vector<8x128xbf16>, vector<128x128xbf16>, vector<8x128xf32> -> vector<8x128xf32>
    %394 = arith.addf %13, %393 : vector<8x128xf32>
    %395 = math.tanh %394 : vector<8x128xf32>
    %cst_91 = arith.constant 1.000000e+00 : f32
    %396 = vector.broadcast %cst_91 : f32 to vector<8x1xf32>
    %397 = arith.cmpf olt, %385, %396 : vector<8x1xf32>
    %398 = arith.extui %397 : vector<8x1xi1> to vector<8x1xi32>
    %399 = arith.sitofp %398 : vector<8x1xi32> to vector<8x1xf32>
    %400 = vector.broadcast %3 : vector<1x128xf32> to vector<8x128xf32>
    %401 = arith.mulf %395, %400 : vector<8x128xf32>
    %cst_92 = arith.constant dense<0.000000e+00> : vector<8xf32>
    %402 = vector.multi_reduction <add>, %401, %cst_92 [1] : vector<8x128xf32> to vector<8xf32>
    %403 = vector.shape_cast %402 : vector<8xf32> to vector<8x1xf32>
    %404 = vector.broadcast %4 : f32 to vector<8x1xf32>
    %405 = arith.addf %403, %404 : vector<8x1xf32>
    %406 = arith.negf %405 : vector<8x1xf32>
    %407 = math.exp %406 : vector<8x1xf32>
    %cst_93 = arith.constant 1.000000e+00 : f32
    %408 = vector.broadcast %cst_93 : f32 to vector<8x1xf32>
    %409 = arith.addf %408, %407 : vector<8x1xf32>
    %410 = arith.divf %408, %409 : vector<8x1xf32>
    %cst_94 = arith.constant 1.000000e+00 : f32
    %411 = vector.broadcast %cst_94 : f32 to vector<8x1xf32>
    %cst_95 = arith.constant 1.000000e+00 : f32
    %412 = vector.broadcast %cst_95 : f32 to vector<8x1xf32>
    %413 = arith.subf %412, %385 : vector<8x1xf32>
    %cst_96 = arith.constant 1.000000e-15 : f32
    %414 = vector.broadcast %cst_96 : f32 to vector<8x1xf32>
    %415 = arith.addf %413, %414 : vector<8x1xf32>
    %cst_97 = arith.constant 1.000000e+00 : f32
    %416 = vector.broadcast %cst_97 : f32 to vector<8x1xf32>
    %417 = arith.subf %416, %411 : vector<8x1xf32>
    %418 = arith.mulf %399, %417 : vector<8x1xf32>
    %419 = arith.mulf %410, %418 : vector<8x1xf32>
    %420 = arith.mulf %415, %411 : vector<8x1xf32>
    %421 = arith.addf %419, %420 : vector<8x1xf32>
    %422 = vector.broadcast %421 : vector<8x1xf32> to vector<8x128xf32>
    %423 = arith.mulf %422, %395 : vector<8x128xf32>
    %424 = arith.addf %388, %423 : vector<8x128xf32>
    %425 = arith.mulf %421, %418 : vector<8x1xf32>
    %426 = arith.addf %390, %425 : vector<8x1xf32>
    %427 = arith.addf %391, %418 : vector<8x1xf32>
    %c0_98 = arith.constant 0 : index
    %c0_99 = arith.constant 0 : index
    %428 = vector.load %arg9[%c0_98, %c0_99] : memref<8x128xf32, #tpu.memory_space<vmem>>, vector<8x128xf32>
    tpu.vector_store %arg9[%c0_98, %c0_99], %424 {strides = array<i32>} : memref<8x128xf32, #tpu.memory_space<vmem>>, vector<8x128xf32>,
    %429 = tpu.iota {dimensions = array<i32: 1>} : vector<8x128xi32>
    %c0_i32_100 = arith.constant 0 : i32
    %430 = vector.broadcast %c0_i32_100 : i32 to vector<8x128xi32>
    %431 = arith.cmpi eq, %429, %430 : vector<8x128xi32>
    %cst_101 = arith.constant 0.000000e+00 : f32
    %432 = vector.shape_cast %426 : vector<8x1xf32> to vector<8x1xf32>
    %433 = vector.broadcast %432 : vector<8x1xf32> to vector<8x128xf32>
    %434 = vector.broadcast %cst_101 : f32 to vector<8x128xf32>
    %435 = arith.select %431, %433, %434 : vector<8x128xi1>, vector<8x128xf32>
    %c1_i32_102 = arith.constant 1 : i32
    %436 = vector.broadcast %c1_i32_102 : i32 to vector<8x128xi32>
    %437 = arith.cmpi eq, %429, %436 : vector<8x128xi32>
    %cst_103 = arith.constant 0.000000e+00 : f32
    %438 = vector.shape_cast %427 : vector<8x1xf32> to vector<8x1xf32>
    %439 = vector.broadcast %438 : vector<8x1xf32> to vector<8x128xf32>
    %440 = vector.broadcast %cst_103 : f32 to vector<8x128xf32>
    %441 = arith.select %437, %439, %440 : vector<8x128xi1>, vector<8x128xf32>
    %442 = arith.addf %435, %441 : vector<8x128xf32>
    %c0_104 = arith.constant 0 : index
    %c0_105 = arith.constant 0 : index
    %443 = vector.load %arg10[%c0_104, %c0_105] : memref<8x128xf32, #tpu.memory_space<vmem>>, vector<8x128xf32>
    tpu.vector_store %arg10[%c0_104, %c0_105], %442 {strides = array<i32>} : memref<8x128xf32, #tpu.memory_space<vmem>>, vector<8x128xf32>,
    return
  }
  func.func @transform_0(%arg0: i32) -> (i32, i32) {
    %c0_i32 = arith.constant 0 : i32
    %c0_i32_0 = arith.constant 0 : i32
    return %arg0, %c0_i32 : i32, i32
  }
  func.func @transform_1(%arg0: i32) -> (i32, i32) {
    %c0_i32 = arith.constant 0 : i32
    %c0_i32_0 = arith.constant 0 : i32
    return %arg0, %c0_i32 : i32, i32
  }
  func.func @transform_2(%arg0: i32) -> (i32, i32) {
    %c0_i32 = arith.constant 0 : i32
    %c0_i32_0 = arith.constant 0 : i32
    %c0_i32_1 = arith.constant 0 : i32
    return %c0_i32, %c0_i32_0 : i32, i32
  }
  func.func @transform_3(%arg0: i32) -> (i32, i32) {
    %c0_i32 = arith.constant 0 : i32
    %c0_i32_0 = arith.constant 0 : i32
    %c0_i32_1 = arith.constant 0 : i32
    return %c0_i32, %c0_i32_0 : i32, i32
  }
  func.func @transform_4(%arg0: i32) -> (i32, i32) {
    %c0_i32 = arith.constant 0 : i32
    %c0_i32_0 = arith.constant 0 : i32
    %c0_i32_1 = arith.constant 0 : i32
    return %c0_i32, %c0_i32_0 : i32, i32
  }
  func.func @transform_5(%arg0: i32) -> (i32, i32) {
    %c0_i32 = arith.constant 0 : i32
    %c0_i32_0 = arith.constant 0 : i32
    %c0_i32_1 = arith.constant 0 : i32
    return %c0_i32, %c0_i32_0 : i32, i32
  }
  func.func @transform_6(%arg0: i32) -> (i32, i32) {
    %c0_i32 = arith.constant 0 : i32
    %c0_i32_0 = arith.constant 0 : i32
    %c0_i32_1 = arith.constant 0 : i32
    return %c0_i32, %c0_i32_0 : i32, i32
  }
  func.func @transform_7(%arg0: i32) -> (i32, i32) {
    %c0_i32 = arith.constant 0 : i32
    %c0_i32_0 = arith.constant 0 : i32
    %c0_i32_1 = arith.constant 0 : i32
    return %c0_i32, %c0_i32_0 : i32, i32
  }
  func.func @transform_8(%arg0: i32) -> (i32, i32) {
    %c0_i32 = arith.constant 0 : i32
    %c0_i32_0 = arith.constant 0 : i32
    return %arg0, %c0_i32 : i32, i32
  }
  func.func @transform_9(%arg0: i32) -> (i32, i32) {
    %c0_i32 = arith.constant 0 : i32
    %c0_i32_0 = arith.constant 0 : i32
    return %arg0, %c0_i32 : i32, i32
  }
}

</mosaic_0001>

<bundles_post_ra>
// kernel: act_rnn_cell.1
= control target key start
LH: loop header
LB: loop body
LE: loop exit
PB: predicated region body
PF: predicated region fallthrough
CT: control target
= control target key end

     0   :  { %v1345_v0 = vmov 0.0   ;;  %vm1346_vm0 = vmmov 0   ;;  %s1810_s2 = inlined_call_operand.vmem [shape: bf16[128,128], index: 2, kind: input, shape index: {}]   ;;  %s1811_s3 = inlined_call_operand.vmem [shape: bf16[128,128], index: 3, kind: input, shape index: {}]   ;;  %s1812_s0 = inlined_call_operand.vmem [shape: f32[8,128], index: 0, kind: input, shape index: {}]   ;;  %s1813_s1 = inlined_call_operand.vmem [shape: f32[8,128], index: 1, kind: input, shape index: {}]   ;;  %s1814_s6 = inlined_call_operand.vmem [shape: f32[1,128], index: 6, kind: input, shape index: {}]   ;;  %s1815_s4 = inlined_call_operand.vmem [shape: f32[1,128], index: 4, kind: input, shape index: {}]   ;;  %s1816_s7 = inlined_call_operand.<no memory space> [shape: f32[1,1], index: 7, kind: input, shape index: {}]   ;;  %s1817_s5 = inlined_call_operand.vmem [shape: f32[1,128], index: 5, kind: input, shape index: {}]   ;;  %s1818_s8 = inlined_call_operand.vmem [shape: f32[8,128], index: 8, kind: output, shape index: {0}]   ;;  %s1819_s9 = inlined_call_operand.vmem [shape: f32[8,128], index: 9, kind: output, shape index: {1}]  }
   0x1   :  { %1069 = vmatprep.subr.bf16.mxu0 %v1345_v0  ;;  %1089 = vmatprep.subr.bf16.mxu1 %v1345_v0  ;;  %v1271_v1 = vld [vmem:[%s1810_s2] sm:$0xff]   ;;  %v1273_v3 = vld [vmem:[%s1810_s2 + $0x8] sm:$0xff]   ;;  %v1275_v5 = vld [vmem:[%s1810_s2 + $0x10] sm:$0xff]   ;;  %v1580_v37 = vstv %s1816_s7 }
   0x2   :  { %v1405_v2 = vld [vmem:[%s1811_s3] sm:$0xff]   ;;  %1085 = vmatprep.mubr.msk.bf16.mxu0 %vm1346_vm0, %v1345_v0  ;;  %1105 = vmatprep.mubr.msk.bf16.mxu1 %vm1346_vm0, %v1345_v0  ;;  %v1419_v4 = vld [vmem:[%s1811_s3 + $0x8] sm:$0xff]   ;;  %v1430_v6 = vld [vmem:[%s1811_s3 + $0x10] sm:$0xff]  }
   0x3   :  { %1070 = vmatpush3.bf16.msra.mxu0 %v1271_v1  ;;  %1090 = vmatpush3.bf16.msra.mxu1 %v1405_v2  ;;  %v1277_v7 = vld [vmem:[%s1810_s2 + $0x18] sm:$0xff]   ;;  %v1279_v9 = vld [vmem:[%s1810_s2 + $0x20] sm:$0xff]   ;;  %v1281_v11 = vld [vmem:[%s1810_s2 + $0x28] sm:$0xff]  }
   0x4   :  { %1071 = vmatprep.subr.bf16.mxu0 %v1345_v0  ;;  %1091 = vmatprep.subr.bf16.mxu1 %v1345_v0  ;;  %v1441_v8 = vld [vmem:[%s1811_s3 + $0x18] sm:$0xff]   ;;  %v1452_v10 = vld [vmem:[%s1811_s3 + $0x20] sm:$0xff]   ;;  %v1463_v12 = vld [vmem:[%s1811_s3 + $0x28] sm:$0xff]  }
   0x5   :  { %v1283_v13 = vld [vmem:[%s1810_s2 + $0x30] sm:$0xff]   ;;  %v1285_v15 = vld [vmem:[%s1810_s2 + $0x38] sm:$0xff]   ;;  %v33_v16 = vld [vmem:[%s1812_s0] sm:$0xff] }
   0x6   :  { %v1474_v14 = vld [vmem:[%s1811_s3 + $0x30] sm:$0xff]   ;;  %v1488_v17 = vld [vmem:[%s1811_s3 + $0x38] sm:$0xff]   ;;  %v1493_v18 = vld [vmem:[%s1813_s1] sm:$0xff]  ;;  %v53_v19 = vpack.c.bf16 %v33_v16, %v33_v16 }
   0x7   :  { %1072 = vmatpush3.bf16.msra.mxu0 %v1273_v3  ;;  %1092 = vmatpush3.bf16.msra.mxu1 %v1419_v4  ;;  %v209_v20 = vpack.c.bf16 %v1493_v18, %v1493_v18  ;;  %v1540_v21 = vld [vmem:[%s1814_s6] ss:$0 sm:$0xff] }
   0x8   :  { %1073 = vmatprep.subr.bf16.mxu0 %v1345_v0  ;;  %1093 = vmatprep.subr.bf16.mxu1 %v1345_v0  ;;  %v183_v22 = vmul.f32 %v1540_v21, %v1493_v18  ;;  %v940_v23 = vld [vmem:[%s1815_s4] ss:$0 sm:$0xff] }
   0xa   :  { %184 = vadd.xlane.f32.xlu0 %v183_v22 }
   0xb   :  { %1074 = vmatpush3.bf16.msra.mxu0 %v1275_v5  ;;  %1094 = vmatpush3.bf16.msra.mxu1 %v1430_v6 }
   0xc   :  { %1075 = vmatprep.subr.bf16.mxu0 %v1345_v0  ;;  %1095 = vmatprep.subr.bf16.mxu1 %v1345_v0 }
   0xf   :  { %1076 = vmatpush3.bf16.msra.mxu0 %v1277_v7  ;;  %1096 = vmatpush3.bf16.msra.mxu1 %v1441_v8 }
  0x10   :  { %1077 = vmatprep.subr.bf16.mxu0 %v1345_v0  ;;  %1097 = vmatprep.subr.bf16.mxu1 %v1345_v0 }
  0x13   :  { %1078 = vmatpush3.bf16.msra.mxu0 %v1279_v9  ;;  %1098 = vmatpush3.bf16.msra.mxu1 %v1452_v10 }
  0x14   :  { %1079 = vmatprep.subr.bf16.mxu0 %v1345_v0  ;;  %1099 = vmatprep.subr.bf16.mxu1 %v1345_v0 }
  0x17   :  { %1080 = vmatpush3.bf16.msra.mxu0 %v1281_v11  ;;  %1100 = vmatpush3.bf16.msra.mxu1 %v1463_v12 }
  0x18   :  { %1081 = vmatprep.subr.bf16.mxu0 %v1345_v0  ;;  %1101 = vmatprep.subr.bf16.mxu1 %v1345_v0 }
  0x1b   :  { %1082 = vmatpush3.bf16.msra.mxu0 %v1283_v13  ;;  %1102 = vmatpush3.bf16.msra.mxu1 %v1474_v14 }
  0x1c   :  { %1083 = vmatprep.subr.bf16.mxu0 %v1345_v0  ;;  %1103 = vmatprep.subr.bf16.mxu1 %v1345_v0 }
  0x1f   :  { %1084 = vmatpush3.bf16.msra.mxu0 %v1285_v15  ;;  %1104 = vmatpush3.bf16.msra.mxu1 %v1488_v17 }
  0x20   :  { %1109 = vmatprep.subr.bf16.mxu0 %v1345_v0  ;;  %1129 = vmatprep.subr.bf16.mxu1 %v1345_v0 }
  0x22   :  { %1086 = vmatmul.mubr.bf16.vlgmr.msra.gmra.mrb[0].mxu0 %v53_v19  ;;  %1106 = vmatmul.mubr.bf16.vlgmr.msra.gmra.mrb[0].mxu1 %v209_v20 }
  0x23   :  { %1110 = vmatpush3.bf16.msra.mxu0 %v1405_v2  ;;  %1125 = vmatprep.mubr.msk.bf16.mxu0 %vm1346_vm0, %v1345_v0 }
  0x24   :  { %1111 = vmatprep.subr.bf16.mxu0 %v1345_v0  ;;  %1130 = vmatpush3.bf16.msra.mxu1 %v1405_v2 }
  0x25   :  { %1145 = vmatprep.mubr.msk.bf16.mxu1 %vm1346_vm0, %v1345_v0  ;;  %1131 = vmatprep.subr.bf16.mxu1 %v1345_v0 }
  0x27   :  { %1112 = vmatpush3.bf16.msra.mxu0 %v1419_v4 }
  0x28   :  { %1113 = vmatprep.subr.bf16.mxu0 %v1345_v0  ;;  %1132 = vmatpush3.bf16.msra.mxu1 %v1419_v4 }
  0x29   :  { %1133 = vmatprep.subr.bf16.mxu1 %v1345_v0 }
  0x2b   :  { %1114 = vmatpush3.bf16.msra.mxu0 %v1430_v6 }
  0x2c   :  { %1115 = vmatprep.subr.bf16.mxu0 %v1345_v0  ;;  %1134 = vmatpush3.bf16.msra.mxu1 %v1430_v6 }
  0x2d   :  { %1135 = vmatprep.subr.bf16.mxu1 %v1345_v0 }
  0x2f   :  { %1116 = vmatpush3.bf16.msra.mxu0 %v1441_v8 }
  0x30   :  { %1117 = vmatprep.subr.bf16.mxu0 %v1345_v0  ;;  %1136 = vmatpush3.bf16.msra.mxu1 %v1441_v8 }
  0x31   :  { %1137 = vmatprep.subr.bf16.mxu1 %v1345_v0 }
  0x33   :  { %1118 = vmatpush3.bf16.msra.mxu0 %v1452_v10 }
  0x34   :  { %1119 = vmatprep.subr.bf16.mxu0 %v1345_v0  ;;  %1138 = vmatpush3.bf16.msra.mxu1 %v1452_v10 }
  0x35   :  { %1139 = vmatprep.subr.bf16.mxu1 %v1345_v0 }
  0x37   :  { %1120 = vmatpush3.bf16.msra.mxu0 %v1463_v12 }
  0x38   :  { %1121 = vmatprep.subr.bf16.mxu0 %v1345_v0  ;;  %1140 = vmatpush3.bf16.msra.mxu1 %v1463_v12 }
  0x39   :  { %1141 = vmatprep.subr.bf16.mxu1 %v1345_v0 }
  0x3b   :  { %1122 = vmatpush3.bf16.msra.mxu0 %v1474_v14 }
  0x3c   :  { %1123 = vmatprep.subr.bf16.mxu0 %v1345_v0  ;;  %1142 = vmatpush3.bf16.msra.mxu1 %v1474_v14 }
  0x3d   :  { %1143 = vmatprep.subr.bf16.mxu1 %v1345_v0 }
  0x3f   :  { %1124 = vmatpush3.bf16.msra.mxu0 %v1488_v17 }
  0x40   :  { %1149 = vmatprep.subr.bf16.mxu0 %v1345_v0  ;;  %1144 = vmatpush3.bf16.msra.mxu1 %v1488_v17 }
  0x41   :  { %1169 = vmatprep.subr.bf16.mxu1 %v1345_v0 }
  0x97   :  { %v185_v38 = vpop.xlane.xlu0 %184 }
  0x98   :  { %v187_v39 = vadd.f32 %v1580_v37, %v185_v38 }
  0x9a   :  { %v943_v40 = vmul.f32 -1.442695, %v187_v39 }
  0xf5   :  { %v1547_v24 = vpop.f32.mrb[0].mxu0  ;;  %v292_v26 = vpop.f32.mrb[0].mxu1 }
  0xf6   :  { %v1550_v25 = vadd.f32 %v940_v23, %v1547_v24  ;;  %v1087_v27 = vpop.f32.mrb[1].mxu0  ;;  %v1107_v28 = vpop.f32.mrb[1].mxu1 }
  0xf7   :  { %v155_v29 = vpop.f32.mrb[2].mxu0  ;;  %v295_v31 = vpop.f32.mrb[2].mxu1 }
  0xf8   :  { %v298_v30 = vadd.f32 %v292_v26, %v1550_v25  ;;  %v1088_v32 = vpop.f32.mrb[3].mxu0  ;;  %v1108_v33 = vpop.f32.mrb[3].mxu1 }
  0xfa   :  { %1287 = vtanh.f32 %v298_v30 }
  0xfb   :  { %1289 = vpow2.f32 %v943_v40 }
 0x104   :  { %v1553_v34 = vpop.eup %1287 }
 0x105   :  { %v331_v35 = vpack.c.bf16 %v1553_v34, %v1553_v34  ;;  %v303_v36 = vmul.f32 %v1553_v34, %v1540_v21  ;;  %v1290_v41 = vpop.eup %1289 }
 0x106   :  { %v191_v42 = vadd.f32 1.0, %v1290_v41 }
 0x107   :  { %1126 = vmatmul.mubr.bf16.vlgmr.msra.gmra.mrb[4].mxu0 %v331_v35  ;;  %304 = vadd.xlane.f32.xlu0 %v303_v36 }
 0x108   :  { %1150 = vmatpush3.bf16.msra.mxu0 %v1405_v2  ;;  %1165 = vmatprep.mubr.msk.bf16.mxu0 %vm1346_vm0, %v1345_v0  ;;  %1291 = vrcp.f32 %v191_v42 }
 0x109   :  { %1151 = vmatprep.subr.bf16.mxu0 %v1345_v0 }
 0x10c   :  { %1152 = vmatpush3.bf16.msra.mxu0 %v1419_v4 }
 0x10d   :  { %1153 = vmatprep.subr.bf16.mxu0 %v1345_v0 }
 0x110   :  { %1154 = vmatpush3.bf16.msra.mxu0 %v1430_v6 }
 0x111   :  { %1155 = vmatprep.subr.bf16.mxu0 %v1345_v0 }
 0x112   :  { %v1292_v45 = vpop.eup %1291 }
 0x113   :  { %vm196_vm1 = vcmp.gt.f32.partialorder %v1292_v45, 0.9 }
 0x114   :  { %1156 = vmatpush3.bf16.msra.mxu0 %v1441_v8  ;;  %v944_v47 = vsel %vm196_vm1, 1.0, %v1345_v0 }
 0x115   :  { %1157 = vmatprep.subr.bf16.mxu0 %v1345_v0  ;;  %v1585_v48 = vsub.f32 1.0, %v944_v47 }
 0x117   :  { %v201_v50 = vmul.f32 %v1292_v45, %v1585_v48 }
 0x118   :  { %1158 = vmatpush3.bf16.msra.mxu0 %v1452_v10 }
 0x119   :  { %1159 = vmatprep.subr.bf16.mxu0 %v1345_v0  ;;  %v1588_v52 = vadd.f32 %v944_v47, %v201_v50 }
 0x11b   :  { %vm300_vm2 = vcmp.lt.f32.partialorder %v1588_v52, 1.0  ;;  %v318_v56 = vsub.f32 1.0, %v1588_v52  ;;  %v206_v40 = vmul.f32 %v1588_v52, %v1585_v48  ;;  %v204_v41 = vmul.f32 %v1588_v52, %v1493_v18 }
 0x11c   :  { %1160 = vmatpush3.bf16.msra.mxu0 %v1463_v12  ;;  %v953_v53 = vsel %vm300_vm2, 1.0, %v1345_v0 }
 0x11d   :  { %1161 = vmatprep.subr.bf16.mxu0 %v1345_v0  ;;  %v319_v59 = vadd.f32 1e-15, %v318_v56 }
 0x120   :  { %1162 = vmatpush3.bf16.msra.mxu0 %v1474_v14 }
 0x121   :  { %1163 = vmatprep.subr.bf16.mxu0 %v1345_v0 }
 0x124   :  { %1164 = vmatpush3.bf16.msra.mxu0 %v1488_v17 }
 0x125   :  { %1189 = vmatprep.subr.bf16.mxu0 %v1345_v0 }
 0x194   :  { %v305_v43 = vpop.xlane.xlu0 %304 }
 0x195   :  { %v306_v44 = vadd.f32 %v305_v43, %v1580_v37 }
 0x197   :  { %v954_v46 = vmul.f32 -1.442695, %v306_v44 }
 0x199   :  { %1293 = vpow2.f32 %v954_v46 }
 0x1a3   :  { %v1294_v49 = vpop.eup %1293 }
 0x1a4   :  { %v310_v51 = vadd.f32 1.0, %v1294_v49 }
 0x1a6   :  { %1295 = vrcp.f32 %v310_v51 }
 0x1b0   :  { %v1296_v54 = vpop.eup %1295 }
 0x1b1   :  { %v313_v55 = vmul.f32 %v1296_v54, %v953_v53 }
 0x1b3   :  { %v314_v57 = vadd.f32 %v313_v55, %v1588_v52  ;;  %v941_v55 = vld [vmem:[%s1817_s5] ss:$0 sm:$0xff] }
 0x1b5   :  { %vm315_vm3 = vcmp.gt.f32.partialorder %v314_v57, 0.9 }
 0x1b6   :  { %v955_v58 = vsel %vm315_vm3, 1.0, %v1345_v0 }
 0x1b7   :  { %v320_v60 = vsub.f32 1.0, %v955_v58  ;;  %v323_v63 = vmul.f32 %v955_v58, %v319_v59 }
 0x1b9   :  { %v321_v61 = vmul.f32 %v953_v53, %v320_v60 }
 0x1bb   :  { %v322_v62 = vmul.f32 %v1296_v54, %v321_v61  ;;  %v330_v36 = vadd.f32 %v321_v61, %v1585_v48  ;;  %v1634_v48 = vadd.f32 %v941_v55, %v1547_v24 }
 0x1bd   :  { %v324_v1 = vadd.f32 %v323_v63, %v322_v62 }
 0x1bf   :  { %v328_v3 = vmul.f32 %v324_v1, %v321_v61  ;;  %v1617_v27 = vadd.f32 %v324_v1, %v1588_v52  ;;  %v326_v42 = vmul.f32 %v1553_v34, %v324_v1 }
 0x1c1   :  { %vm374_vm4 = vcmp.lt.f32.partialorder %v1617_v27, 1.0  ;;  %v392_v32 = vsub.f32 1.0, %v1617_v27  ;;  %v327_v47 = vadd.f32 %v326_v42, %v204_v41  ;;  %v329_v49 = vadd.f32 %v328_v3, %v206_v40 }
 0x1c2   :  { %v956_v29 = vsel %vm374_vm4, 1.0, %v1345_v0 }
 0x1c3   :  { %v393_v38 = vadd.f32 1e-15, %v392_v32 }
 0x1da   :  { %v366_v5 = vpop.f32.mrb[4].mxu0 }
 0x1db   :  { %v372_v7 = vadd.f32 %v366_v5, %v1550_v25  ;;  %v1127_v9 = vpop.f32.mrb[5].mxu0 }
 0x1dc   :  { %v369_v11 = vpop.f32.mrb[6].mxu0 }
 0x1dd   :  { %1297 = vtanh.f32 %v372_v7  ;;  %v1128_v13 = vpop.f32.mrb[7].mxu0 }
 0x1e7   :  { %v1298_v15 = vpop.eup %1297 }
 0x1e8   :  { %v405_v16 = vpack.c.bf16 %v1298_v15, %v1298_v15  ;;  %v377_v19 = vmul.f32 %v1298_v15, %v1540_v21 }
 0x1ea   :  { %1146 = vmatmul.mubr.bf16.vlgmr.msra.gmra.mrb[4].mxu1 %v405_v16  ;;  %378 = vadd.xlane.f32.xlu1 %v377_v19 }
 0x1eb   :  { %1170 = vmatpush3.bf16.msra.mxu1 %v1405_v2  ;;  %1185 = vmatprep.mubr.msk.bf16.mxu1 %vm1346_vm0, %v1345_v0 }
 0x1ec   :  { %1171 = vmatprep.subr.bf16.mxu1 %v1345_v0 }
 0x1ef   :  { %1172 = vmatpush3.bf16.msra.mxu1 %v1419_v4 }
 0x1f0   :  { %1173 = vmatprep.subr.bf16.mxu1 %v1345_v0 }
 0x1f3   :  { %1174 = vmatpush3.bf16.msra.mxu1 %v1430_v6 }
 0x1f4   :  { %1175 = vmatprep.subr.bf16.mxu1 %v1345_v0 }
 0x1f7   :  { %1176 = vmatpush3.bf16.msra.mxu1 %v1441_v8 }
 0x1f8   :  { %1177 = vmatprep.subr.bf16.mxu1 %v1345_v0 }
 0x1fb   :  { %1178 = vmatpush3.bf16.msra.mxu1 %v1452_v10 }
 0x1fc   :  { %1179 = vmatprep.subr.bf16.mxu1 %v1345_v0 }
 0x1ff   :  { %1180 = vmatpush3.bf16.msra.mxu1 %v1463_v12 }
 0x200   :  { %1181 = vmatprep.subr.bf16.mxu1 %v1345_v0 }
 0x203   :  { %1182 = vmatpush3.bf16.msra.mxu1 %v1474_v14 }
 0x204   :  { %1183 = vmatprep.subr.bf16.mxu1 %v1345_v0 }
 0x207   :  { %1184 = vmatpush3.bf16.msra.mxu1 %v1488_v17 }
 0x208   :  { %1209 = vmatprep.subr.bf16.mxu1 %v1345_v0 }
 0x277   :  { %v379_v20 = vpop.xlane.xlu1 %378 }
 0x278   :  { %v380_v22 = vadd.f32 %v379_v20, %v1580_v37 }
 0x27a   :  { %v957_v23 = vmul.f32 -1.442695, %v380_v22 }
 0x27c   :  { %1299 = vpow2.f32 %v957_v23 }
 0x286   :  { %v1300_v25 = vpop.eup %1299 }
 0x287   :  { %v384_v26 = vadd.f32 1.0, %v1300_v25 }
 0x289   :  { %1301 = vrcp.f32 %v384_v26 }
 0x293   :  { %v1302_v28 = vpop.eup %1301 }
 0x294   :  { %v387_v30 = vmul.f32 %v1302_v28, %v956_v29 }
 0x296   :  { %v388_v31 = vadd.f32 %v387_v30, %v1617_v27 }
 0x298   :  { %vm389_vm5 = vcmp.gt.f32.partialorder %v388_v31, 0.9 }
 0x299   :  { %v958_v33 = vsel %vm389_vm5, 1.0, %v1345_v0 }
 0x29a   :  { %v394_v35 = vsub.f32 1.0, %v958_v33  ;;  %v397_v44 = vmul.f32 %v958_v33, %v393_v38 }
 0x29c   :  { %v395_v39 = vmul.f32 %v956_v29, %v394_v35 }
 0x29e   :  { %v396_v43 = vmul.f32 %v1302_v28, %v395_v39  ;;  %v404_v45 = vadd.f32 %v395_v39, %v330_v36 }
 0x2a0   :  { %v398_v46 = vadd.f32 %v397_v44, %v396_v43 }
 0x2a2   :  { %v400_v50 = vmul.f32 %v1298_v15, %v398_v46  ;;  %v402_v51 = vmul.f32 %v398_v46, %v395_v39  ;;  %v399_v3 = vadd.f32 %v398_v46, %v1617_v27 }
 0x2a4   :  { %v401_v53 = vadd.f32 %v400_v50, %v327_v47  ;;  %v403_v54 = vadd.f32 %v402_v51, %v329_v49  ;;  %vm448_vm6 = vcmp.lt.f32.partialorder %v399_v3, 1.0  ;;  %v466_v13 = vsub.f32 1.0, %v399_v3 }
 0x2a5   :  { %v959_v7 = vsel %vm448_vm6, 1.0, %v1345_v0 }
 0x2a6   :  { %v467_v19 = vadd.f32 1e-15, %v466_v13 }
 0x2bd   :  { %v440_v18 = vpop.f32.mrb[4].mxu1 }
 0x2be   :  { %v446_v34 = vadd.f32 %v440_v18, %v1634_v48  ;;  %v1147_v52 = vpop.f32.mrb[5].mxu1 }
 0x2bf   :  { %v443_v56 = vpop.f32.mrb[6].mxu1 }
 0x2c0   :  { %1303 = vtanh.f32 %v446_v34  ;;  %v1148_v57 = vpop.f32.mrb[7].mxu1 }
 0x2ca   :  { %v1304_v58 = vpop.eup %1303 }
 0x2cb   :  { %v479_v59 = vpack.c.bf16 %v1304_v58, %v1304_v58  ;;  %v451_v60 = vmul.f32 %v1304_v58, %v1540_v21 }
 0x2cd   :  { %1166 = vmatmul.mubr.bf16.vlgmr.msra.gmra.mrb[8].mxu0 %v479_v59  ;;  %452 = vadd.xlane.f32.xlu1 %v451_v60 }
 0x2ce   :  { %1190 = vmatpush3.bf16.msra.mxu0 %v1405_v2  ;;  %1205 = vmatprep.mubr.msk.bf16.mxu0 %vm1346_vm0, %v1345_v0 }
 0x2cf   :  { %1191 = vmatprep.subr.bf16.mxu0 %v1345_v0 }
 0x2d2   :  { %1192 = vmatpush3.bf16.msra.mxu0 %v1419_v4 }
 0x2d3   :  { %1193 = vmatprep.subr.bf16.mxu0 %v1345_v0 }
 0x2d6   :  { %1194 = vmatpush3.bf16.msra.mxu0 %v1430_v6 }
 0x2d7   :  { %1195 = vmatprep.subr.bf16.mxu0 %v1345_v0 }
 0x2da   :  { %1196 = vmatpush3.bf16.msra.mxu0 %v1441_v8 }
 0x2db   :  { %1197 = vmatprep.subr.bf16.mxu0 %v1345_v0 }
 0x2de   :  { %1198 = vmatpush3.bf16.msra.mxu0 %v1452_v10 }
 0x2df   :  { %1199 = vmatprep.subr.bf16.mxu0 %v1345_v0 }
 0x2e2   :  { %1200 = vmatpush3.bf16.msra.mxu0 %v1463_v12 }
 0x2e3   :  { %1201 = vmatprep.subr.bf16.mxu0 %v1345_v0 }
 0x2e6   :  { %1202 = vmatpush3.bf16.msra.mxu0 %v1474_v14 }
 0x2e7   :  { %1203 = vmatprep.subr.bf16.mxu0 %v1345_v0 }
 0x2ea   :  { %1204 = vmatpush3.bf16.msra.mxu0 %v1488_v17 }
 0x2eb   :  { %1229 = vmatprep.subr.bf16.mxu0 %v1345_v0 }
 0x35a   :  { %v453_v24 = vpop.xlane.xlu1 %452 }
 0x35b   :  { %v454_v61 = vadd.f32 %v453_v24, %v1580_v37 }
 0x35d   :  { %v960_v62 = vmul.f32 -1.442695, %v454_v61 }
 0x35f   :  { %1305 = vpow2.f32 %v960_v62 }
 0x369   :  { %v1306_v63 = vpop.eup %1305 }
 0x36a   :  { %v458_v1 = vadd.f32 1.0, %v1306_v63 }
 0x36c   :  { %1307 = vrcp.f32 %v458_v1 }
 0x376   :  { %v1308_v5 = vpop.eup %1307 }
 0x377   :  { %v461_v9 = vmul.f32 %v1308_v5, %v959_v7 }
 0x379   :  { %v462_v11 = vadd.f32 %v461_v9, %v399_v3 }
 0x37b   :  { %vm463_vm7 = vcmp.gt.f32.partialorder %v462_v11, 0.9 }
 0x37c   :  { %v961_v15 = vsel %vm463_vm7, 1.0, %v1345_v0 }
 0x37d   :  { %v468_v16 = vsub.f32 1.0, %v961_v15  ;;  %v471_v23 = vmul.f32 %v961_v15, %v467_v19 }
 0x37f   :  { %v469_v20 = vmul.f32 %v959_v7, %v468_v16 }
 0x381   :  { %v470_v22 = vmul.f32 %v1308_v5, %v469_v20  ;;  %v478_v25 = vadd.f32 %v469_v20, %v404_v45 }
 0x383   :  { %v472_v26 = vadd.f32 %v471_v23, %v470_v22 }
 0x385   :  { %v474_v28 = vmul.f32 %v1304_v58, %v472_v26  ;;  %v476_v29 = vmul.f32 %v472_v26, %v469_v20  ;;  %v1681_v46 = vadd.f32 %v472_v26, %v399_v3 }
 0x387   :  { %v475_v27 = vadd.f32 %v474_v28, %v401_v53  ;;  %v477_v30 = vadd.f32 %v476_v29, %v403_v54  ;;  %vm522_vm8 = vcmp.lt.f32.partialorder %v1681_v46, 1.0  ;;  %v540_v53 = vsub.f32 1.0, %v1681_v46 }
 0x388   :  { %v962_v49 = vsel %vm522_vm8, 1.0, %v1345_v0 }
 0x389   :  { %v541_v18 = vadd.f32 1e-15, %v540_v53 }
 0x3a0   :  { %v514_v31 = vpop.f32.mrb[8].mxu0 }
 0x3a1   :  { %v520_v32 = vadd.f32 %v514_v31, %v1634_v48  ;;  %v1167_v33 = vpop.f32.mrb[9].mxu0 }
 0x3a2   :  { %v517_v35 = vpop.f32.mrb[10].mxu0 }
 0x3a3   :  { %1309 = vtanh.f32 %v520_v32  ;;  %v1168_v36 = vpop.f32.mrb[11].mxu0 }
 0x3ad   :  { %v1310_v38 = vpop.eup %1309 }
 0x3ae   :  { %v553_v39 = vpack.c.bf16 %v1310_v38, %v1310_v38  ;;  %v525_v40 = vmul.f32 %v1310_v38, %v1540_v21 }
 0x3b0   :  { %1186 = vmatmul.mubr.bf16.vlgmr.msra.gmra.mrb[8].mxu1 %v553_v39  ;;  %526 = vadd.xlane.f32.xlu0 %v525_v40 }
 0x3b1   :  { %1210 = vmatpush3.bf16.msra.mxu1 %v1405_v2  ;;  %1225 = vmatprep.mubr.msk.bf16.mxu1 %vm1346_vm0, %v1345_v0 }
 0x3b2   :  { %1211 = vmatprep.subr.bf16.mxu1 %v1345_v0 }
 0x3b5   :  { %1212 = vmatpush3.bf16.msra.mxu1 %v1419_v4 }
 0x3b6   :  { %1213 = vmatprep.subr.bf16.mxu1 %v1345_v0 }
 0x3b9   :  { %1214 = vmatpush3.bf16.msra.mxu1 %v1430_v6 }
 0x3ba   :  { %1215 = vmatprep.subr.bf16.mxu1 %v1345_v0 }
 0x3bd   :  { %1216 = vmatpush3.bf16.msra.mxu1 %v1441_v8 }
 0x3be   :  { %1217 = vmatprep.subr.bf16.mxu1 %v1345_v0 }
 0x3c1   :  { %1218 = vmatpush3.bf16.msra.mxu1 %v1452_v10 }
 0x3c2   :  { %1219 = vmatprep.subr.bf16.mxu1 %v1345_v0 }
 0x3c5   :  { %1220 = vmatpush3.bf16.msra.mxu1 %v1463_v12 }
 0x3c6   :  { %1221 = vmatprep.subr.bf16.mxu1 %v1345_v0 }
 0x3c9   :  { %1222 = vmatpush3.bf16.msra.mxu1 %v1474_v14 }
 0x3ca   :  { %1223 = vmatprep.subr.bf16.mxu1 %v1345_v0 }
 0x3cd   :  { %1224 = vmatpush3.bf16.msra.mxu1 %v1488_v17 }
 0x3ce   :  { %1249 = vmatprep.subr.bf16.mxu1 %v1345_v0 }
 0x43d   :  { %v527_v41 = vpop.xlane.xlu0 %526 }
 0x43e   :  { %v528_v42 = vadd.f32 %v527_v41, %v1580_v37 }
 0x440   :  { %v963_v43 = vmul.f32 -1.442695, %v528_v42 }
 0x442   :  { %1311 = vpow2.f32 %v963_v43 }
 0x44c   :  { %v1312_v44 = vpop.eup %1311 }
 0x44d   :  { %v532_v45 = vadd.f32 1.0, %v1312_v44 }
 0x44f   :  { %1313 = vrcp.f32 %v532_v45 }
 0x459   :  { %v1314_v47 = vpop.eup %1313 }
 0x45a   :  { %v535_v50 = vmul.f32 %v1314_v47, %v962_v49 }
 0x45c   :  { %v536_v51 = vadd.f32 %v535_v50, %v1681_v46 }
 0x45e   :  { %vm537_vm9 = vcmp.gt.f32.partialorder %v536_v51, 0.9 }
 0x45f   :  { %v964_v54 = vsel %vm537_vm9, 1.0, %v1345_v0 }
 0x460   :  { %v542_v55 = vsub.f32 1.0, %v964_v54  ;;  %v545_v56 = vmul.f32 %v964_v54, %v541_v18 }
 0x462   :  { %v543_v34 = vmul.f32 %v962_v49, %v542_v55 }
 0x464   :  { %v544_v52 = vmul.f32 %v1314_v47, %v543_v34  ;;  %v1688_v57 = vadd.f32 %v543_v34, %v478_v25 }
 0x466   :  { %v1690_v58 = vadd.f32 %v545_v56, %v544_v52 }
 0x468   :  { %v548_v59 = vmul.f32 %v1310_v38, %v1690_v58  ;;  %v550_v60 = vmul.f32 %v1690_v58, %v543_v34  ;;  %v547_v50 = vadd.f32 %v1690_v58, %v1681_v46 }
 0x46a   :  { %v1694_v24 = vadd.f32 %v548_v59, %v475_v27  ;;  %v1696_v61 = vadd.f32 %v550_v60, %v477_v30  ;;  %vm596_vm10 = vcmp.lt.f32.partialorder %v547_v50, 1.0  ;;  %v614_v59 = vsub.f32 1.0, %v547_v50 }
 0x46c   :  { %v615_v58 = vadd.f32 1e-15, %v614_v59 }
 0x483   :  { %v588_v62 = vpop.f32.mrb[8].mxu1 }
 0x484   :  { %v594_v63 = vadd.f32 %v588_v62, %v1634_v48  ;;  %v1187_v1 = vpop.f32.mrb[9].mxu1 }
 0x485   :  { %v591_v3 = vpop.f32.mrb[10].mxu1 }
 0x486   :  { %1315 = vtanh.f32 %v594_v63  ;;  %v1188_v5 = vpop.f32.mrb[11].mxu1 }
 0x490   :  { %v1699_v7 = vpop.eup %1315 }
 0x491   :  { %v627_v9 = vpack.c.bf16 %v1699_v7, %v1699_v7  ;;  %v599_v11 = vmul.f32 %v1699_v7, %v1540_v21 }
 0x493   :  { %1206 = vmatmul.mubr.bf16.vlgmr.msra.gmra.mrb[12].mxu0 %v627_v9  ;;  %600 = vadd.xlane.f32.xlu1 %v599_v11 }
 0x494   :  { %1230 = vmatpush3.bf16.msra.mxu0 %v1405_v2  ;;  %1245 = vmatprep.mubr.msk.bf16.mxu0 %vm1346_vm0, %v1345_v0 }
 0x495   :  { %1231 = vmatprep.subr.bf16.mxu0 %v1345_v0 }
 0x498   :  { %1232 = vmatpush3.bf16.msra.mxu0 %v1419_v4 }
 0x499   :  { %1233 = vmatprep.subr.bf16.mxu0 %v1345_v0 }
 0x49c   :  { %1234 = vmatpush3.bf16.msra.mxu0 %v1430_v6 }
 0x49d   :  { %1235 = vmatprep.subr.bf16.mxu0 %v1345_v0 }
 0x4a0   :  { %1236 = vmatpush3.bf16.msra.mxu0 %v1441_v8 }
 0x4a1   :  { %1237 = vmatprep.subr.bf16.mxu0 %v1345_v0 }
 0x4a4   :  { %1238 = vmatpush3.bf16.msra.mxu0 %v1452_v10 }
 0x4a5   :  { %1239 = vmatprep.subr.bf16.mxu0 %v1345_v0 }
 0x4a8   :  { %1240 = vmatpush3.bf16.msra.mxu0 %v1463_v12 }
 0x4a9   :  { %1241 = vmatprep.subr.bf16.mxu0 %v1345_v0 }
 0x4ac   :  { %1242 = vmatpush3.bf16.msra.mxu0 %v1474_v14 }
 0x4ad   :  { %1243 = vmatprep.subr.bf16.mxu0 %v1345_v0 }
 0x4b0   :  { %1244 = vmatpush3.bf16.msra.mxu0 %v1488_v17 }
 0x520   :  { %v601_v35 = vpop.xlane.xlu1 %600 }
 0x521   :  { %v602_v36 = vadd.f32 %v601_v35, %v1580_v37 }
 0x523   :  { %v966_v38 = vmul.f32 -1.442695, %v602_v36 }
 0x566   :  { %v662_v13 = vpop.f32.mrb[12].mxu0 }
 0x567   :  { %v668_v15 = vadd.f32 %v662_v13, %v1634_v48  ;;  %v1207_v16 = vpop.f32.mrb[13].mxu0 }
 0x568   :  { %v665_v19 = vpop.f32.mrb[14].mxu0 }
 0x569   :  { %1317 = vtanh.f32 %v668_v15  ;;  %v1208_v20 = vpop.f32.mrb[15].mxu0 }
 0x573   :  { %v1723_v22 = vpop.eup %1317 }
 0x574   :  { %v701_v23 = vpack.c.bf16 %v1723_v22, %v1723_v22  ;;  %v673_v25 = vmul.f32 %v1723_v22, %v1540_v21 }
 0x576   :  { %1226 = vmatmul.mubr.bf16.vlgmr.msra.gmra.mrb[12].mxu1 %v701_v23  ;;  %674 = vadd.xlane.f32.xlu0 %v673_v25 }
 0x577   :  { %1250 = vmatpush3.bf16.msra.mxu1 %v1405_v2  ;;  %1265 = vmatprep.mubr.msk.bf16.mxu1 %vm1346_vm0, %v1345_v0 }
 0x578   :  { %1251 = vmatprep.subr.bf16.mxu1 %v1345_v0 }
 0x57b   :  { %1252 = vmatpush3.bf16.msra.mxu1 %v1419_v4 }
 0x57c   :  { %1253 = vmatprep.subr.bf16.mxu1 %v1345_v0 }
 0x57f   :  { %1254 = vmatpush3.bf16.msra.mxu1 %v1430_v6 }
 0x580   :  { %1255 = vmatprep.subr.bf16.mxu1 %v1345_v0 }
 0x583   :  { %1256 = vmatpush3.bf16.msra.mxu1 %v1441_v8 }
 0x584   :  { %1257 = vmatprep.subr.bf16.mxu1 %v1345_v0 }
 0x587   :  { %1258 = vmatpush3.bf16.msra.mxu1 %v1452_v10 }
 0x588   :  { %1259 = vmatprep.subr.bf16.mxu1 %v1345_v0 }
 0x58b   :  { %1260 = vmatpush3.bf16.msra.mxu1 %v1463_v12 }
 0x58c   :  { %1261 = vmatprep.subr.bf16.mxu1 %v1345_v0 }
 0x58f   :  { %1262 = vmatpush3.bf16.msra.mxu1 %v1474_v14 }
 0x590   :  { %1263 = vmatprep.subr.bf16.mxu1 %v1345_v0 }
 0x593   :  { %1264 = vmatpush3.bf16.msra.mxu1 %v1488_v17 }
 0x603   :  { %v675_v53 = vpop.xlane.xlu0 %674 }
 0x604   :  { %v676_v55 = vadd.f32 %v675_v53, %v1580_v37 }
 0x606   :  { %v969_v34 = vmul.f32 -1.442695, %v676_v55 }
 0x649   :  { %v736_v2 = vpop.f32.mrb[12].mxu1 }
 0x64a   :  { %v742_v4 = vadd.f32 %v736_v2, %v1634_v48  ;;  %v1227_v6 = vpop.f32.mrb[13].mxu1 }
 0x64b   :  { %v739_v8 = vpop.f32.mrb[14].mxu1 }
 0x64c   :  { %1319 = vtanh.f32 %v742_v4  ;;  %v1228_v26 = vpop.f32.mrb[15].mxu1 }
 0x656   :  { %v1747_v10 = vpop.eup %1319 }
 0x657   :  { %v775_v12 = vpack.c.bf16 %v1747_v10, %v1747_v10  ;;  %v747_v28 = vmul.f32 %v1747_v10, %v1540_v21 }
 0x659   :  { %1246 = vmatmul.mubr.bf16.vlgmr.msra.gmra.mrb[16].mxu0 %v775_v12  ;;  %748 = vadd.xlane.f32.xlu1 %v747_v28 }
 0x6e6   :  { %v749_v9 = vpop.xlane.xlu1 %748 }
 0x6e7   :  { %v750_v15 = vadd.f32 %v749_v9, %v1580_v37 }
 0x6e9   :  { %v972_v19 = vmul.f32 -1.442695, %v750_v15 }
 0x72c   :  { %v810_v14 = vpop.f32.mrb[16].mxu0 }
 0x72d   :  { %v816_v17 = vadd.f32 %v810_v14, %v1634_v48  ;;  %v1247_v29 = vpop.f32.mrb[17].mxu0 }
 0x72e   :  { %v813_v27 = vpop.f32.mrb[18].mxu0 }
 0x72f   :  { %1321 = vtanh.f32 %v816_v17  ;;  %v1248_v30 = vpop.f32.mrb[19].mxu0 }
 0x730   :  { %1323 = vpow2.f32 %v966_v38 }
 0x739   :  { %v1754_v31 = vpop.eup %1321 }
 0x73a   :  { %v849_v32 = vpack.c.bf16 %v1754_v31, %v1754_v31  ;;  %v821_v33 = vmul.f32 %v1754_v31, %v1540_v21  ;;  %v1324_v44 = vpop.eup %1323 }
 0x73b   :  { %v606_v47 = vadd.f32 1.0, %v1324_v44 }
 0x73c   :  { %1266 = vmatmul.mubr.bf16.vlgmr.msra.gmra.mrb[16].mxu1 %v849_v32  ;;  %822 = vadd.xlane.f32.xlu0 %v821_v33 }
 0x7c9   :  { %v823_v29 = vpop.xlane.xlu0 %822 }
 0x7ca   :  { %v824_v32 = vadd.f32 %v823_v29, %v1580_v37 }
 0x7cc   :  { %v975_v35 = vmul.f32 -1.442695, %v824_v32 }
 0x80f   :  { %v884_v39 = vpop.f32.mrb[16].mxu1 }
 0x810   :  { %v890_v40 = vadd.f32 %v884_v39, %v1634_v48  ;;  %v1267_v41 = vpop.f32.mrb[17].mxu1  ;;  %v965_v48 = vsel %vm596_vm10, 1.0, %v1345_v0 }
 0x811   :  { %v887_v42 = vpop.f32.mrb[18].mxu1 }
 0x812   :  { %1325 = vtanh.f32 %v890_v40  ;;  %v1268_v43 = vpop.f32.mrb[19].mxu1 }
 0x813   :  { %1327 = vrcp.f32 %v606_v47 }
 0x814   :  { %1329 = vpow2.f32 %v969_v34 }
 0x81c   :  { %v1762_v45 = vpop.eup %1325 }
 0x81d   :  { %v895_v49 = vmul.f32 %v1762_v45, %v1540_v21  ;;  %v1328_v51 = vpop.eup %1327 }
 0x81e   :  { %v609_v54 = vmul.f32 %v1328_v51, %v965_v48  ;;  %v1330_v56 = vpop.eup %1329 }
 0x81f   :  { %896 = vadd.xlane.f32.xlu1 %v895_v49  ;;  %v680_v46 = vadd.f32 1.0, %v1330_v56 }
 0x820   :  { %v610_v18 = vadd.f32 %v609_v54, %v547_v50 }
 0x821   :  { %1331 = vrcp.f32 %v680_v46 }
 0x822   :  { %vm611_vm11 = vcmp.gt.f32.partialorder %v610_v18, 0.9  ;;  %1333 = vpow2.f32 %v972_v19 }
 0x823   :  { %v967_v52 = vsel %vm611_vm11, 1.0, %v1345_v0 }
 0x824   :  { %v616_v21 = vsub.f32 1.0, %v967_v52  ;;  %v619_v63 = vmul.f32 %v967_v52, %v615_v58 }
 0x826   :  { %v1771_v60 = vmul.f32 %v965_v48, %v616_v21 }
 0x828   :  { %v618_v62 = vmul.f32 %v1328_v51, %v1771_v60  ;;  %v626_v19 = vadd.f32 %v1771_v60, %v1688_v57 }
 0x82a   :  { %v1774_v1 = vadd.f32 %v619_v63, %v618_v62 }
 0x82b   :  { %v1332_v5 = vpop.eup %1331 }
 0x82c   :  { %v621_v3 = vadd.f32 %v1774_v1, %v547_v50  ;;  %v1334_v25 = vpop.eup %1333 }
 0x82d   :  { %v754_v6 = vadd.f32 1.0, %v1334_v25 }
 0x82e   :  { %vm670_vm12 = vcmp.lt.f32.partialorder %v621_v3, 1.0  ;;  %v688_v2 = vsub.f32 1.0, %v621_v3 }
 0x82f   :  { %v968_v11 = vsel %vm670_vm12, 1.0, %v1345_v0  ;;  %1335 = vrcp.f32 %v754_v6 }
 0x830   :  { %v683_v13 = vmul.f32 %v1332_v5, %v968_v11  ;;  %v689_v8 = vadd.f32 1e-15, %v688_v2  ;;  %1337 = vpow2.f32 %v975_v35 }
 0x832   :  { %v684_v16 = vadd.f32 %v683_v13, %v621_v3  ;;  %v624_v13 = vmul.f32 %v1774_v1, %v1771_v60 }
 0x834   :  { %vm685_vm13 = vcmp.gt.f32.partialorder %v684_v16, 0.9  ;;  %v625_v25 = vadd.f32 %v624_v13, %v1696_v61 }
 0x835   :  { %v970_v20 = vsel %vm685_vm13, 1.0, %v1345_v0 }
 0x836   :  { %v690_v23 = vsub.f32 1.0, %v970_v20  ;;  %v693_v12 = vmul.f32 %v970_v20, %v689_v8 }
 0x838   :  { %v1780_v4 = vmul.f32 %v968_v11, %v690_v23  ;;  %v622_v11 = vmul.f32 %v1699_v7, %v1774_v1  ;;  %v916_v7 = vlaneseq }
 0x839   :  { %v1336_v17 = vpop.eup %1335 }
 0x83a   :  { %v692_v26 = vmul.f32 %v1332_v5, %v1780_v4  ;;  %v1338_v39 = vpop.eup %1337  ;;  %v623_v23 = vadd.f32 %v622_v11, %v1694_v24  ;;  %v700_v6 = vadd.f32 %v1780_v4, %v626_v19  ;;  %v917_v24 = vand.u32 127, %v916_v7 }
 0x83b   :  { %v828_v42 = vadd.f32 1.0, %v1338_v39 }
 0x83c   :  { %v694_v28 = vadd.f32 %v693_v12, %v692_v26  ;;  %vm918_vm3 = vcmp.eq.s32.totalorder %v917_v24, 0  ;;  %vm920_vm4 = vcmp.eq.s32.totalorder %v917_v24, 1 }
 0x83d   :  { %1339 = vrcp.f32 %v828_v42 }
 0x83e   :  { %v695_v14 = vadd.f32 %v694_v28, %v621_v3  ;;  %v698_v15 = vmul.f32 %v694_v28, %v1780_v4 }
 0x840   :  { %vm744_vm14 = vcmp.lt.f32.partialorder %v695_v14, 1.0  ;;  %v762_v40 = vsub.f32 1.0, %v695_v14  ;;  %v699_v12 = vadd.f32 %v698_v15, %v625_v25 }
 0x841   :  { %v971_v27 = vsel %vm744_vm14, 1.0, %v1345_v0 }
 0x842   :  { %v757_v30 = vmul.f32 %v1336_v17, %v971_v27  ;;  %v763_v43 = vadd.f32 1e-15, %v762_v40 }
 0x844   :  { %v758_v33 = vadd.f32 %v757_v30, %v695_v14 }
 0x846   :  { %vm759_vm15 = vcmp.gt.f32.partialorder %v758_v33, 0.9 }
 0x847   :  { %v973_v36 = vsel %vm759_vm15, 1.0, %v1345_v0  ;;  %v1340_v51 = vpop.eup %1339 }
 0x848   :  { %v764_v38 = vsub.f32 1.0, %v973_v36  ;;  %v767_v47 = vmul.f32 %v973_v36, %v763_v43 }
 0x84a   :  { %v765_v41 = vmul.f32 %v971_v27, %v764_v38 }
 0x84c   :  { %v766_v44 = vmul.f32 %v1336_v17, %v765_v41 }
 0x84e   :  { %v768_v49 = vadd.f32 %v767_v47, %v766_v44 }
 0x850   :  { %v769_v50 = vadd.f32 %v768_v49, %v695_v14  ;;  %v770_v2 = vmul.f32 %v1747_v10, %v768_v49  ;;  %v772_v1 = vmul.f32 %v768_v49, %v765_v41 }
 0x852   :  { %vm818_vm0 = vcmp.lt.f32.partialorder %v769_v50, 1.0  ;;  %v836_v56 = vsub.f32 1.0, %v769_v50  ;;  %v773_v29 = vadd.f32 %v772_v1, %v699_v12 }
 0x853   :  { %v974_v53 = vsel %vm818_vm0, 1.0, %v1345_v0 }
 0x854   :  { %v831_v48 = vmul.f32 %v1340_v51, %v974_v53  ;;  %v837_v46 = vadd.f32 1e-15, %v836_v56 }
 0x856   :  { %v832_v54 = vadd.f32 %v831_v48, %v769_v50 }
 0x858   :  { %vm833_vm1 = vcmp.gt.f32.partialorder %v832_v54, 0.9 }
 0x859   :  { %v976_v55 = vsel %vm833_vm1, 1.0, %v1345_v0 }
 0x85a   :  { %v838_v34 = vsub.f32 1.0, %v976_v55  ;;  %v841_v62 = vmul.f32 %v976_v55, %v837_v46 }
 0x85c   :  { %v839_v59 = vmul.f32 %v974_v53, %v838_v34 }
 0x85e   :  { %v840_v58 = vmul.f32 %v1340_v51, %v839_v59 }
 0x860   :  { %v842_v63 = vadd.f32 %v841_v62, %v840_v58 }
 0x862   :  { %v843_v9 = vadd.f32 %v842_v63, %v769_v50  ;;  %v846_v14 = vmul.f32 %v842_v63, %v839_v59 }
 0x864   :  { %vm892_vm2 = vcmp.lt.f32.partialorder %v843_v9, 1.0  ;;  %v905_v20 = vsub.f32 1.0, %v843_v9  ;;  %v847_v30 = vadd.f32 %v846_v14, %v773_v29 }
 0x865   :  { %v977_v16 = vsel %vm892_vm2, 1.0, %v1345_v0  ;;  %v844_v0 = vmul.f32 %v1754_v31, %v842_v63 }
 0x866   :  { %v907_v8 = vmul.f32 0.0, %v977_v16  ;;  %v906_v57 = vadd.f32 1e-15, %v905_v20 }
 0x8ac   :  { %v897_v18 = vpop.xlane.xlu1 %896 }
 0x8ad   :  { %v898_v52 = vadd.f32 %v897_v18, %v1580_v37  ;;  %v696_v37 = vmul.f32 %v1723_v22, %v694_v28  ;;  %v774_v28 = vadd.f32 %v765_v41, %v700_v6 }
 0x8af   :  { %v978_v21 = vmul.f32 -1.442695, %v898_v52  ;;  %v697_v26 = vadd.f32 %v696_v37, %v623_v23  ;;  %v848_v61 = vadd.f32 %v839_v59, %v774_v28 }
 0x8b1   :  { %1341 = vpow2.f32 %v978_v21  ;;  %v771_v17 = vadd.f32 %v770_v2, %v697_v26  ;;  %v914_v33 = vadd.f32 %v907_v8, %v848_v61 }
 0x8b3   :  { %v845_v10 = vadd.f32 %v844_v0, %v771_v17  ;;  %v921_v38 = vsel %vm920_vm4, %v914_v33, 0.0 }
 0x8bb   :  { %v1342_v3 = vpop.eup %1341 }
 0x8bc   :  { %v902_v5 = vadd.f32 1.0, %v1342_v3 }
 0x8be   :  { %1343 = vrcp.f32 %v902_v5 }
 0x8c8   :  { %v1344_v22 = vpop.eup %1343 }
 0x8c9   :  { %v908_v60 = vmul.f32 %v1344_v22, %v907_v8 }
 0x8cb   :  { %v909_v27 = vadd.f32 %v908_v60, %v906_v57 }
 0x8cd   :  { %v910_v4 = vmul.f32 %v1762_v45, %v909_v27  ;;  %v912_v32 = vmul.f32 %v909_v27, %v907_v8 }
 0x8cf   :  { %v911_v35 = vadd.f32 %v910_v4, %v845_v10  ;;  %v913_v36 = vadd.f32 %v912_v32, %v847_v30 }
 0x8d1   :  { %915 = vst [vmem:[%s1818_s8] sm:$0xff] %v911_v35  ;;  %v919_v31 = vsel %vm918_vm3, %v913_v36, 0.0 }
 0x8d2   :  { %v922_v39 = vadd.f32 %v921_v38, %v919_v31 }
 0x8d4   :  { %923 = vst [vmem:[%s1819_s9] sm:$0xff] %v922_v39 }

</bundles_post_ra>
